<compile_context>
chip_gen: v7x
topology: tpu7x:2x2x1
jax: 0.10.0
libtpu: 0.0.40
codegen_flags: <defaults>
</compile_context>

<pallas_src>
import numpy as np
import jax
import jax.numpy as jnp
from jax.experimental import pallas as pl
from jax.experimental.pallas import tpu as pltpu


def dsconv_kernel(x_ref, idx_ref, wf_ref, o_ref):
    # x_ref  : (1, num_points, C_in)    per-batch point table, VMEM resident
    # idx_ref: (TN, seq) int32          node-tile of gather indices
    # wf_ref : (seq, C_in, C_out_pad)   fused depthwise*linear weight
    # o_ref  : (1, TN, C_out_pad)       lane-dense output tile
    x_b = x_ref[0]                                      # (P, C_in)
    idx = idx_ref[...]                                  # (TN, seq)
    tn, seq = idx_ref.shape
    num_points = x_ref.shape[1]
    c_out_pad = o_ref.shape[2]

    # Lane-iota of point ids, hoisted out of the seq loop.
    point_ids = jax.lax.broadcasted_iota(jnp.int32, (tn, num_points), 1)

    acc = jnp.zeros((tn, c_out_pad), jnp.float32)
    # seq = K*K is small (9 / 25 / ...) -> static unrolled loop. Each step is
    # two MXU matmuls: a one-hot gather (TN,P)@(P,C_in) of the needed rows of x,
    # then the fused-weight contraction (TN,C_in)@(C_in,C_out_pad), accumulated
    # in f32.  (On v6e/v7x the dot inputs could be cast to bf16 for extra MXU
    # throughput; kept f32 here for the tight correctness check.)
    for s in range(seq):
        onehot = (idx[:, s:s + 1] == point_ids).astype(x_b.dtype)      # (TN, P)
        gathered = jnp.dot(onehot, x_b,
                           preferred_element_type=jnp.float32)          # (TN, C_in)
        acc = acc + jnp.dot(gathered.astype(wf_ref.dtype), wf_ref[s],
                            preferred_element_type=jnp.float32)         # (TN, C_out_pad)

    o_ref[0] = acc.astype(o_ref.dtype)


def _round_up(v, m):
    return (v + m - 1) // m * m


def dsconv_forward(x, indices, w_spatial, w_channel, *, node_tile=256):
    """x: (bs, num_points, C_in); indices: (n_nodes, seq);
       w_spatial: (C_in, seq); w_channel: (C_in, C_out) -> (bs, n_nodes, C_out)."""
    bs, num_points, c_in = x.shape
    n_nodes, seq = indices.shape
    c_out = w_channel.shape[-1]

    # Fused weight wf[s, c, o] = w_spatial[c, s] * w_channel[c, o], padded to a
    # lane-dense (multiple-of-128) output-channel count.
    c_out_pad = _round_up(c_out, 128)
    wf = w_spatial.T[:, :, None] * w_channel[None, :, :]          # (seq, C_in, C_out)
    if c_out_pad != c_out:
        wf = jnp.pad(wf, ((0, 0), (0, 0), (0, c_out_pad - c_out)))

    # Node tiling: TN rows per grid step (multiple of 8); pad n_nodes up to it.
    tn = min(node_tile, _round_up(n_nodes, 8))
    n_nodes_pad = _round_up(n_nodes, tn)
    idx = indices.astype(jnp.int32)
    if n_nodes_pad != n_nodes:
        # Padded node rows gather point 0; their outputs are sliced off below.
        idx = jnp.pad(idx, ((0, n_nodes_pad - n_nodes), (0, 0)))

    grid = (bs, n_nodes_pad // tn)

    out = pl.pallas_call(
        dsconv_kernel,
        out_shape=jax.ShapeDtypeStruct((bs, n_nodes_pad, c_out_pad), x.dtype),
        grid_spec=pltpu.PrefetchScalarGridSpec(
            num_scalar_prefetch=0,
            grid=grid,
            in_specs=[
                # Whole per-batch point table resides in VMEM (small: P x C_in).
                pl.BlockSpec((1, num_points, c_in), lambda b, n: (b, 0, 0)),
                # Node-tile of gather indices.
                pl.BlockSpec((tn, seq), lambda b, n: (n, 0)),
                # Fused weight, broadcast to every grid step.
                pl.BlockSpec((seq, c_in, c_out_pad), lambda b, n: (0, 0, 0)),
            ],
            out_specs=pl.BlockSpec((1, tn, c_out_pad), lambda b, n: (b, n, 0)),
        ),
        compiler_params=pltpu.CompilerParams(
            dimension_semantics=("parallel", "parallel"),
            vmem_limit_bytes=32 * 1024 * 1024,   # tiles are tiny; safe on v5e/v6e/v7x
        ),
    )(x, idx, wf)

    # Strip node / channel padding (kernel-side stores stayed lane-dense).
    return out[:, :n_nodes, :c_out]


def dsconv_reference(x, indices, w_spatial, w_channel):
    # Pure-JAX replica of the PyTorch forward (for a correctness check).
    bs = x.shape[0]
    n_nodes, seq = indices.shape
    c_in = x.shape[-1]
    xg = jnp.take(x, indices.reshape(-1), axis=1).reshape(bs, n_nodes, seq, c_in)
    y = jnp.einsum('bnsc,cs->bnc', xg, w_spatial)      # depthwise KxK conv -> 1x1
    return jnp.einsum('bnc,co->bno', y, w_channel)     # channel Linear, no bias


if __name__ == "__main__":
    key = jax.random.PRNGKey(0)

    bs = 2
    num_points = 32      # number of points in x that indices select from
    c_in = 4             # in_channels
    c_out = 8            # out_channels
    k = 3                # Conv2d kernel size = sqrt(seq_length)
    seq = k * k          # seq_length = 9
    n_nodes = 200        # exercises node tiling + padding (node_tile=64 -> grid (2, 4))

    kx, ki, kws, kwl = jax.random.split(key, 4)
    x = jax.random.normal(kx, (bs, num_points, c_in), dtype=jnp.float32)
    indices = jax.random.randint(ki, (n_nodes, seq), 0, num_points, dtype=jnp.int32)

    # spatial_layer weight: depthwise Conv2d weight (C_in, 1, k, k), flattened.
    w_spatial = (jax.random.normal(kws, (c_in, 1, k, k), dtype=jnp.float32)
                 * (1.0 / np.sqrt(seq))).reshape(c_in, seq)

    # channel_layer weight: nn.Linear(C_in, C_out) weight is (C_out, C_in),
    # xavier-uniform init; kernel consumes its transpose (C_in, C_out).
    limit = float(np.sqrt(6.0 / (c_in + c_out)))
    w_lin_torch = jax.random.uniform(kwl, (c_out, c_in), minval=-limit,
                                     maxval=limit, dtype=jnp.float32)
    w_channel = w_lin_torch.T

    out = dsconv_forward(x, indices, w_spatial, w_channel, node_tile=64)
    out = jax.block_until_ready(out)

    ref = dsconv_reference(x, indices, w_spatial, w_channel)
    assert out.shape == (bs, n_nodes, c_out)
    np.testing.assert_allclose(np.asarray(out), np.asarray(ref),
                               rtol=1e-4, atol=1e-4)
    print("KERNEL_OK")
</pallas_src>

<mosaic_0001>
module attributes {stable_mosaic.version = 11 : i64} {
  func.func @dsconv_kernel(%arg0: i32, %arg1: i32, %arg2: memref<1x32x4xf32, #tpu.memory_space<vmem>>, %arg3: memref<64x9xi32, #tpu.memory_space<vmem>>, %arg4: memref<9x4x128xf32, #tpu.memory_space<vmem>>, %arg5: memref<1x64x128xf32, #tpu.memory_space<vmem>>) attributes {dimension_semantics = [#tpu.dimension_semantics<parallel>, #tpu.dimension_semantics<parallel>], iteration_bounds = array<i64: 2, 4>, scalar_prefetch = 0 : i64, scratch_operands = 0 : i64, tpu.core_type = #tpu.core_type<tc>, window_params = [{transform_indices = @transform_0, window_bounds = array<i64: 1, 32, 4>}, {transform_indices = @transform_1, window_bounds = array<i64: 64, 9>}, {pipeline_mode = #tpu.pipeline_mode<synchronous>, transform_indices = @transform_2, window_bounds = array<i64: 9, 4, 128>}, {transform_indices = @transform_3, window_bounds = array<i64: 1, 64, 128>}]} {
    %c0 = arith.constant 0 : index
    %c0_0 = arith.constant 0 : index
    %c0_1 = arith.constant 0 : index
    %0 = vector.load %arg2[%c0, %c0_0, %c0_1] : memref<1x32x4xf32, #tpu.memory_space<vmem>>, vector<1x32x4xf32>
    %1 = vector.shape_cast %0 : vector<1x32x4xf32> to vector<32x4xf32>
    %c0_2 = arith.constant 0 : index
    %c0_3 = arith.constant 0 : index
    %2 = vector.load %arg3[%c0_2, %c0_3] : memref<64x9xi32, #tpu.memory_space<vmem>>, vector<64x9xi32>
    %3 = tpu.iota {dimensions = array<i32: 1>} : vector<64x32xi32>
    %cst = arith.constant 0.000000e+00 : f32
    %4 = vector.broadcast %cst : f32 to vector<64x128xf32>
    %5 = vector.extract_strided_slice %2 {offsets = [0, 0], sizes = [64, 1], strides = [1, 1]} : vector<64x9xi32> to vector<64x1xi32>
    %6 = vector.broadcast %5 : vector<64x1xi32> to vector<64x32xi32>
    %7 = arith.cmpi eq, %6, %3 : vector<64x32xi32>
    %8 = arith.extui %7 : vector<64x32xi1> to vector<64x32xi32>
    %9 = arith.sitofp %8 : vector<64x32xi32> to vector<64x32xf32>
    %cst_4 = arith.constant dense<0.000000e+00> : vector<64x4xf32>
    %10 = tpu.matmul %9, %1, %cst_4 {dimension_numbers = #tpu.dot_dimension_numbers<[1], [0], [0], [1], [0, 0, 1, 1], [], []>} : vector<64x32xf32>, vector<32x4xf32>, vector<64x4xf32> -> vector<64x4xf32>
    %c0_5 = arith.constant 0 : index
    %c0_6 = arith.constant 0 : index
    %c0_7 = arith.constant 0 : index
    %11 = vector.load %arg4[%c0_5, %c0_6, %c0_7] : memref<9x4x128xf32, #tpu.memory_space<vmem>>, vector<1x4x128xf32>
    %12 = vector.shape_cast %11 : vector<1x4x128xf32> to vector<4x128xf32>
    %cst_8 = arith.constant dense<0.000000e+00> : vector<64x128xf32>
    %13 = tpu.matmul %10, %12, %cst_8 {dimension_numbers = #tpu.dot_dimension_numbers<[1], [0], [0], [1], [0, 0, 1, 1], [], []>} : vector<64x4xf32>, vector<4x128xf32>, vector<64x128xf32> -> vector<64x128xf32>
    %14 = arith.addf %4, %13 : vector<64x128xf32>
    %15 = vector.extract_strided_slice %2 {offsets = [0, 1], sizes = [64, 1], strides = [1, 1]} : vector<64x9xi32> to vector<64x1xi32>
    %16 = vector.broadcast %15 : vector<64x1xi32> to vector<64x32xi32>
    %17 = arith.cmpi eq, %16, %3 : vector<64x32xi32>
    %18 = arith.extui %17 : vector<64x32xi1> to vector<64x32xi32>
    %19 = arith.sitofp %18 : vector<64x32xi32> to vector<64x32xf32>
    %cst_9 = arith.constant dense<0.000000e+00> : vector<64x4xf32>
    %20 = tpu.matmul %19, %1, %cst_9 {dimension_numbers = #tpu.dot_dimension_numbers<[1], [0], [0], [1], [0, 0, 1, 1], [], []>} : vector<64x32xf32>, vector<32x4xf32>, vector<64x4xf32> -> vector<64x4xf32>
    %c1 = arith.constant 1 : index
    %c0_10 = arith.constant 0 : index
    %c0_11 = arith.constant 0 : index
    %21 = vector.load %arg4[%c1, %c0_10, %c0_11] : memref<9x4x128xf32, #tpu.memory_space<vmem>>, vector<1x4x128xf32>
    %22 = vector.shape_cast %21 : vector<1x4x128xf32> to vector<4x128xf32>
    %cst_12 = arith.constant dense<0.000000e+00> : vector<64x128xf32>
    %23 = tpu.matmul %20, %22, %cst_12 {dimension_numbers = #tpu.dot_dimension_numbers<[1], [0], [0], [1], [0, 0, 1, 1], [], []>} : vector<64x4xf32>, vector<4x128xf32>, vector<64x128xf32> -> vector<64x128xf32>
    %24 = arith.addf %14, %23 : vector<64x128xf32>
    %25 = vector.extract_strided_slice %2 {offsets = [0, 2], sizes = [64, 1], strides = [1, 1]} : vector<64x9xi32> to vector<64x1xi32>
    %26 = vector.broadcast %25 : vector<64x1xi32> to vector<64x32xi32>
    %27 = arith.cmpi eq, %26, %3 : vector<64x32xi32>
    %28 = arith.extui %27 : vector<64x32xi1> to vector<64x32xi32>
    %29 = arith.sitofp %28 : vector<64x32xi32> to vector<64x32xf32>
    %cst_13 = arith.constant dense<0.000000e+00> : vector<64x4xf32>
    %30 = tpu.matmul %29, %1, %cst_13 {dimension_numbers = #tpu.dot_dimension_numbers<[1], [0], [0], [1], [0, 0, 1, 1], [], []>} : vector<64x32xf32>, vector<32x4xf32>, vector<64x4xf32> -> vector<64x4xf32>
    %c2 = arith.constant 2 : index
    %c0_14 = arith.constant 0 : index
    %c0_15 = arith.constant 0 : index
    %31 = vector.load %arg4[%c2, %c0_14, %c0_15] : memref<9x4x128xf32, #tpu.memory_space<vmem>>, vector<1x4x128xf32>
    %32 = vector.shape_cast %31 : vector<1x4x128xf32> to vector<4x128xf32>
    %cst_16 = arith.constant dense<0.000000e+00> : vector<64x128xf32>
    %33 = tpu.matmul %30, %32, %cst_16 {dimension_numbers = #tpu.dot_dimension_numbers<[1], [0], [0], [1], [0, 0, 1, 1], [], []>} : vector<64x4xf32>, vector<4x128xf32>, vector<64x128xf32> -> vector<64x128xf32>
    %34 = arith.addf %24, %33 : vector<64x128xf32>
    %35 = vector.extract_strided_slice %2 {offsets = [0, 3], sizes = [64, 1], strides = [1, 1]} : vector<64x9xi32> to vector<64x1xi32>
    %36 = vector.broadcast %35 : vector<64x1xi32> to vector<64x32xi32>
    %37 = arith.cmpi eq, %36, %3 : vector<64x32xi32>
    %38 = arith.extui %37 : vector<64x32xi1> to vector<64x32xi32>
    %39 = arith.sitofp %38 : vector<64x32xi32> to vector<64x32xf32>
    %cst_17 = arith.constant dense<0.000000e+00> : vector<64x4xf32>
    %40 = tpu.matmul %39, %1, %cst_17 {dimension_numbers = #tpu.dot_dimension_numbers<[1], [0], [0], [1], [0, 0, 1, 1], [], []>} : vector<64x32xf32>, vector<32x4xf32>, vector<64x4xf32> -> vector<64x4xf32>
    %c3 = arith.constant 3 : index
    %c0_18 = arith.constant 0 : index
    %c0_19 = arith.constant 0 : index
    %41 = vector.load %arg4[%c3, %c0_18, %c0_19] : memref<9x4x128xf32, #tpu.memory_space<vmem>>, vector<1x4x128xf32>
    %42 = vector.shape_cast %41 : vector<1x4x128xf32> to vector<4x128xf32>
    %cst_20 = arith.constant dense<0.000000e+00> : vector<64x128xf32>
    %43 = tpu.matmul %40, %42, %cst_20 {dimension_numbers = #tpu.dot_dimension_numbers<[1], [0], [0], [1], [0, 0, 1, 1], [], []>} : vector<64x4xf32>, vector<4x128xf32>, vector<64x128xf32> -> vector<64x128xf32>
    %44 = arith.addf %34, %43 : vector<64x128xf32>
    %45 = vector.extract_strided_slice %2 {offsets = [0, 4], sizes = [64, 1], strides = [1, 1]} : vector<64x9xi32> to vector<64x1xi32>
    %46 = vector.broadcast %45 : vector<64x1xi32> to vector<64x32xi32>
    %47 = arith.cmpi eq, %46, %3 : vector<64x32xi32>
    %48 = arith.extui %47 : vector<64x32xi1> to vector<64x32xi32>
    %49 = arith.sitofp %48 : vector<64x32xi32> to vector<64x32xf32>
    %cst_21 = arith.constant dense<0.000000e+00> : vector<64x4xf32>
    %50 = tpu.matmul %49, %1, %cst_21 {dimension_numbers = #tpu.dot_dimension_numbers<[1], [0], [0], [1], [0, 0, 1, 1], [], []>} : vector<64x32xf32>, vector<32x4xf32>, vector<64x4xf32> -> vector<64x4xf32>
    %c4 = arith.constant 4 : index
    %c0_22 = arith.constant 0 : index
    %c0_23 = arith.constant 0 : index
    %51 = vector.load %arg4[%c4, %c0_22, %c0_23] : memref<9x4x128xf32, #tpu.memory_space<vmem>>, vector<1x4x128xf32>
    %52 = vector.shape_cast %51 : vector<1x4x128xf32> to vector<4x128xf32>
    %cst_24 = arith.constant dense<0.000000e+00> : vector<64x128xf32>
    %53 = tpu.matmul %50, %52, %cst_24 {dimension_numbers = #tpu.dot_dimension_numbers<[1], [0], [0], [1], [0, 0, 1, 1], [], []>} : vector<64x4xf32>, vector<4x128xf32>, vector<64x128xf32> -> vector<64x128xf32>
    %54 = arith.addf %44, %53 : vector<64x128xf32>
    %55 = vector.extract_strided_slice %2 {offsets = [0, 5], sizes = [64, 1], strides = [1, 1]} : vector<64x9xi32> to vector<64x1xi32>
    %56 = vector.broadcast %55 : vector<64x1xi32> to vector<64x32xi32>
    %57 = arith.cmpi eq, %56, %3 : vector<64x32xi32>
    %58 = arith.extui %57 : vector<64x32xi1> to vector<64x32xi32>
    %59 = arith.sitofp %58 : vector<64x32xi32> to vector<64x32xf32>
    %cst_25 = arith.constant dense<0.000000e+00> : vector<64x4xf32>
    %60 = tpu.matmul %59, %1, %cst_25 {dimension_numbers = #tpu.dot_dimension_numbers<[1], [0], [0], [1], [0, 0, 1, 1], [], []>} : vector<64x32xf32>, vector<32x4xf32>, vector<64x4xf32> -> vector<64x4xf32>
    %c5 = arith.constant 5 : index
    %c0_26 = arith.constant 0 : index
    %c0_27 = arith.constant 0 : index
    %61 = vector.load %arg4[%c5, %c0_26, %c0_27] : memref<9x4x128xf32, #tpu.memory_space<vmem>>, vector<1x4x128xf32>
    %62 = vector.shape_cast %61 : vector<1x4x128xf32> to vector<4x128xf32>
    %cst_28 = arith.constant dense<0.000000e+00> : vector<64x128xf32>
    %63 = tpu.matmul %60, %62, %cst_28 {dimension_numbers = #tpu.dot_dimension_numbers<[1], [0], [0], [1], [0, 0, 1, 1], [], []>} : vector<64x4xf32>, vector<4x128xf32>, vector<64x128xf32> -> vector<64x128xf32>
    %64 = arith.addf %54, %63 : vector<64x128xf32>
    %65 = vector.extract_strided_slice %2 {offsets = [0, 6], sizes = [64, 1], strides = [1, 1]} : vector<64x9xi32> to vector<64x1xi32>
    %66 = vector.broadcast %65 : vector<64x1xi32> to vector<64x32xi32>
    %67 = arith.cmpi eq, %66, %3 : vector<64x32xi32>
    %68 = arith.extui %67 : vector<64x32xi1> to vector<64x32xi32>
    %69 = arith.sitofp %68 : vector<64x32xi32> to vector<64x32xf32>
    %cst_29 = arith.constant dense<0.000000e+00> : vector<64x4xf32>
    %70 = tpu.matmul %69, %1, %cst_29 {dimension_numbers = #tpu.dot_dimension_numbers<[1], [0], [0], [1], [0, 0, 1, 1], [], []>} : vector<64x32xf32>, vector<32x4xf32>, vector<64x4xf32> -> vector<64x4xf32>
    %c6 = arith.constant 6 : index
    %c0_30 = arith.constant 0 : index
    %c0_31 = arith.constant 0 : index
    %71 = vector.load %arg4[%c6, %c0_30, %c0_31] : memref<9x4x128xf32, #tpu.memory_space<vmem>>, vector<1x4x128xf32>
    %72 = vector.shape_cast %71 : vector<1x4x128xf32> to vector<4x128xf32>
    %cst_32 = arith.constant dense<0.000000e+00> : vector<64x128xf32>
    %73 = tpu.matmul %70, %72, %cst_32 {dimension_numbers = #tpu.dot_dimension_numbers<[1], [0], [0], [1], [0, 0, 1, 1], [], []>} : vector<64x4xf32>, vector<4x128xf32>, vector<64x128xf32> -> vector<64x128xf32>
    %74 = arith.addf %64, %73 : vector<64x128xf32>
    %75 = vector.extract_strided_slice %2 {offsets = [0, 7], sizes = [64, 1], strides = [1, 1]} : vector<64x9xi32> to vector<64x1xi32>
    %76 = vector.broadcast %75 : vector<64x1xi32> to vector<64x32xi32>
    %77 = arith.cmpi eq, %76, %3 : vector<64x32xi32>
    %78 = arith.extui %77 : vector<64x32xi1> to vector<64x32xi32>
    %79 = arith.sitofp %78 : vector<64x32xi32> to vector<64x32xf32>
    %cst_33 = arith.constant dense<0.000000e+00> : vector<64x4xf32>
    %80 = tpu.matmul %79, %1, %cst_33 {dimension_numbers = #tpu.dot_dimension_numbers<[1], [0], [0], [1], [0, 0, 1, 1], [], []>} : vector<64x32xf32>, vector<32x4xf32>, vector<64x4xf32> -> vector<64x4xf32>
    %c7 = arith.constant 7 : index
    %c0_34 = arith.constant 0 : index
    %c0_35 = arith.constant 0 : index
    %81 = vector.load %arg4[%c7, %c0_34, %c0_35] : memref<9x4x128xf32, #tpu.memory_space<vmem>>, vector<1x4x128xf32>
    %82 = vector.shape_cast %81 : vector<1x4x128xf32> to vector<4x128xf32>
    %cst_36 = arith.constant dense<0.000000e+00> : vector<64x128xf32>
    %83 = tpu.matmul %80, %82, %cst_36 {dimension_numbers = #tpu.dot_dimension_numbers<[1], [0], [0], [1], [0, 0, 1, 1], [], []>} : vector<64x4xf32>, vector<4x128xf32>, vector<64x128xf32> -> vector<64x128xf32>
    %84 = arith.addf %74, %83 : vector<64x128xf32>
    %85 = vector.extract_strided_slice %2 {offsets = [0, 8], sizes = [64, 1], strides = [1, 1]} : vector<64x9xi32> to vector<64x1xi32>
    %86 = vector.broadcast %85 : vector<64x1xi32> to vector<64x32xi32>
    %87 = arith.cmpi eq, %86, %3 : vector<64x32xi32>
    %88 = arith.extui %87 : vector<64x32xi1> to vector<64x32xi32>
    %89 = arith.sitofp %88 : vector<64x32xi32> to vector<64x32xf32>
    %cst_37 = arith.constant dense<0.000000e+00> : vector<64x4xf32>
    %90 = tpu.matmul %89, %1, %cst_37 {dimension_numbers = #tpu.dot_dimension_numbers<[1], [0], [0], [1], [0, 0, 1, 1], [], []>} : vector<64x32xf32>, vector<32x4xf32>, vector<64x4xf32> -> vector<64x4xf32>
    %c8 = arith.constant 8 : index
    %c0_38 = arith.constant 0 : index
    %c0_39 = arith.constant 0 : index
    %91 = vector.load %arg4[%c8, %c0_38, %c0_39] : memref<9x4x128xf32, #tpu.memory_space<vmem>>, vector<1x4x128xf32>
    %92 = vector.shape_cast %91 : vector<1x4x128xf32> to vector<4x128xf32>
    %cst_40 = arith.constant dense<0.000000e+00> : vector<64x128xf32>
    %93 = tpu.matmul %90, %92, %cst_40 {dimension_numbers = #tpu.dot_dimension_numbers<[1], [0], [0], [1], [0, 0, 1, 1], [], []>} : vector<64x4xf32>, vector<4x128xf32>, vector<64x128xf32> -> vector<64x128xf32>
    %94 = arith.addf %84, %93 : vector<64x128xf32>
    %c0_41 = arith.constant 0 : index
    %c0_42 = arith.constant 0 : index
    %c0_43 = arith.constant 0 : index
    %95 = vector.load %arg5[%c0_41, %c0_42, %c0_43] : memref<1x64x128xf32, #tpu.memory_space<vmem>>, vector<1x64x128xf32>
    %96 = vector.shape_cast %95 : vector<1x64x128xf32> to vector<64x128xf32>
    %97 = vector.shape_cast %94 : vector<64x128xf32> to vector<1x64x128xf32>
    tpu.vector_store %arg5[%c0_41, %c0_42, %c0_43], %97 {strides = array<i32>} : memref<1x64x128xf32, #tpu.memory_space<vmem>>, vector<1x64x128xf32>,
    return
  }
  func.func @transform_0(%arg0: i32, %arg1: i32) -> (i32, i32, i32) {
    %c0_i32 = arith.constant 0 : i32
    %c0_i32_0 = arith.constant 0 : i32
    %c0_i32_1 = arith.constant 0 : i32
    return %arg0, %c0_i32, %c0_i32_0 : i32, i32, i32
  }
  func.func @transform_1(%arg0: i32, %arg1: i32) -> (i32, i32) {
    %c0_i32 = arith.constant 0 : i32
    %c0_i32_0 = arith.constant 0 : i32
    return %arg1, %c0_i32 : i32, i32
  }
  func.func @transform_2(%arg0: i32, %arg1: i32) -> (i32, i32, i32) {
    %c0_i32 = arith.constant 0 : i32
    %c0_i32_0 = arith.constant 0 : i32
    %c0_i32_1 = arith.constant 0 : i32
    %c0_i32_2 = arith.constant 0 : i32
    return %c0_i32, %c0_i32_0, %c0_i32_1 : i32, i32, i32
  }
  func.func @transform_3(%arg0: i32, %arg1: i32) -> (i32, i32, i32) {
    %c0_i32 = arith.constant 0 : i32
    %c0_i32_0 = arith.constant 0 : i32
    return %arg0, %arg1, %c0_i32 : i32, i32, i32
  }
}

</mosaic_0001>

<bundles_post_ra>
// kernel: tpu_custom_call.1
= control target key start
LH: loop header
LB: loop body
LE: loop exit
PB: predicated region body
PF: predicated region fallthrough
CT: control target
= control target key end

     0   :  { %8 = vsyncpa [#allocation3], 0  ;;  %s4913_s0 = inlined_call_operand.vmem [shape: f32[2,32,4], index: 0, kind: input, shape index: {}]   ;;  %s4914_s1 = inlined_call_operand.vmem [shape: s32[256,9], index: 1, kind: input, shape index: {}]   ;;  %s4915_s2 = inlined_call_operand.vmem [shape: f32[9,4,128], index: 2, kind: input, shape index: {}]   ;;  %s4916_s3 = inlined_call_operand.hbm [shape: f32[2,256,128], index: 3, kind: output, shape index: {}]  }
   0x1   :  { %10 = vsyncpa [#allocation3 + $0x1], 0  ;;  %s4300_s12 = smov 0   ;;  %s4302_s13 = smov 0  }
   0x2   :  { %s4304_s14 = smov 0   ;;  %s4306_s15 = smov 0  }
   0x3   :  { %s4308_s16 = smov 0   ;;  %s4310_s17 = smov 0  }
   0x4   :  { %s4312_s18 = smov 0   ;;  %s4314_s19 = smov 0  }
   0x5 LB: > { %s3189_s20 = sadd.s32 4294967295, %s4265_s19   ;;  %s3190_s21 = sadd.s32 4294967294, %s4265_s19   ;;  %s4265_s19 = sphi %s4314_s19, %s16_s19   ;;  %s4261_s18 = sphi %s4312_s18, %s4925_s18   ;;  %s4257_s17 = sphi %s4310_s17, %s4924_s17   ;;  %s4253_s16 = sphi %s4308_s16, %s4923_s16   ;;  %s4249_s15 = sphi %s4306_s15, %s4922_s15   ;;  %s4245_s14 = sphi %s4304_s14, %s4921_s14   ;;  %s4241_s13 = sphi %s4302_s13, %s4920_s13   ;;  %s4237_s12 = sphi %s4300_s12, %s4919_s12  }
   0x6   : > { %s25_s22 = sadd.s32 1, %s4257_s17  ;;  %s28_s23 = sadd.s32 1, %s4261_s18 }
   0x7   : > { %p26_p0 = scmp.ge.s32.totalorder %s25_s22, 4  ;;  %p120_p1 = scmp.ne.s32.totalorder %s4245_s14, %s4241_s13 }
   0x8   : > { %p121_p2 = scmp.eq.s32.totalorder %s3189_s20, 7  ;;  %p126_p5 = scmp.ne.s32.totalorder %s4241_s13, %s4237_s12 }
   0x9   : > { %s4927_s22 = smov (%p26_p0, %s25_s22), 0  ;;  %s4929_s23 = smov (!%p26_p0, %s28_s23), %s4261_s18 }
   0xa   : > { %s106_s24 = ssub.s32 %s4257_s17, %s4927_s22  ;;  %p4351_p3 = por %p121_p2, %p120_p1 }
   0xb   : > { %p30_p4 = scmp.ge.s32.totalorder %s4929_s23, 2  ;;  %p127_p6 = scmp.eq.s32.totalorder %s3190_s21, 7 }
   0xc   : > { %p3193_p7 = scmp.ge.s32.totalorder %s4265_s19, 1  ;;  %p165_p9 = scmp.lt.s32.totalorder %s4265_s19, 9 }
   0xd   : > { %s4931_s23 = smov (%p30_p4, %s4929_s23), 0  ;;  %p4360_p8 = por %p127_p6, %p126_p5 }
   0xe   : > { %s105_s27 = ssub.s32 %s4261_s18, %s4931_s23  ;;  %s110_s28 = sadd.s32 1, %s4245_s14 }
   0xf   : > { %s107_s29 = sor.u32 %s106_s24, %s105_s27  ;;  %p166_p10 = pnand %p3193_p7, %p165_p9 }
  0x10   : > { %p108_p11 = scmp.eq.s32.totalorder %s107_s29, 0  ;;  %s4372_s4 = sshll.u32 (!%p166_p10), %s4249_s15, 3  ;;  %v4267_v0 = vmov (!%p166_p10), 0   ;;  %v4268_v15 = vmov (!%p166_p10), 1   ;;  %v4269_v16 = vmov (!%p166_p10), 2   ;;  %v4270_v17 = vmov (!%p166_p10), 3  }
  0x11   : > { %169 = sbr.rel (%p166_p10) target bundleno = 765 (0x2fd), region = 32  ;;  %4154 = vset.pattern.permute.xlu1 (!%p166_p10), %v4267_v0  ;;  %4153 = vset.pattern.permute.xlu0 (!%p166_p10), %v4267_v0  ;;  %p200_p12 = scmp.lt.s32.totalorder (!%p166_p10), %s4372_s4, 31  ;;  %v4271_v18 = vmov (!%p166_p10), 4   ;;  %v4272_v19 = vmov (!%p166_p10), 5   ;;  %v4273_v20 = vmov (!%p166_p10), 6   ;;  %v4274_v21 = vmov (!%p166_p10), 7  }
  0x12   : > { %s4369_s30 = scalar_select %p108_p11, %s4245_s14, %s110_s28  }
  0x13   : > { %p194_p13 = scmp.lt.s32.totalorder (!%p166_p10), %s4253_s16, 1  ;;  %v218_v22 = vlaneseq (!%p166_p10)  ;;  %v4275_v23 = vmov (!%p166_p10), 8   ;;  %vm268_vm0 = vcmask (!%p166_p10), 261120   ;;  %v4276_v27 = vmov (!%p166_p10), 0.0   ;;  %s3434_s8 = sshll.u32 (!%p166_p10), %s4253_s16, 5 }
  0x14   : > { %s4277_s24 = smov (!%p166_p10), [#allocation2]  }
  0x15   : > { %v4470_v24 = vand.u32 (!%p166_p10), 127, %v218_v22  ;;  %s4175_s27 = sshll.u32 (!%p166_p10), %s4277_s24, 4  ;;  %s4176_s27 = int_to_ptr.vmem [resolvable:$false] %s4175_s27 }
  0x16   : > { %s4177_s28 = scalar_lea.vmem (!%p166_p10), %s4176_s27, 2048 }
  0x18   : > { %s201_s5 = scalar_select %p200_p12, %s4372_s4, 31 }
  0x19   : > { %s195_s10 = scalar_select %p194_p13, %s4253_s16, 1 }
  0x1a   : > { %s3198_s6 = sshll.u32 %s201_s5, 3  ;;  %s191_s5 = sand.u32 1, %s4241_s13  }
  0x1b   : > { %s203_s9 = scalar_lea.vmem %s4914_s1, %s3198_s6  ;;  %s3438_s11 = sshll.u32 %s195_s10, 5 }
  0x1c   : > { %v4380_v1 = vld [vmem:[%s203_s9 + $0x10] sm:$0xff]  ;;  %v4382_v2 = vld [vmem:[%s203_s9] sm:$0xff]  ;;  %v4387_v3 = vld [vmem:[%s203_s9 + $0x18] sm:$0xff]  ;;  %s198_s21 = scalar_lea.vmem %s4913_s0, %s3438_s11  ;;  %s3194_s6 = sshll.u32 %s191_s5, 6 }
  0x1d   : > { %227 = vperm.xlu1 %4154, %v4380_v1   ;;  %221 = vperm.xlu0 %4153, %v4382_v2   ;;  %v4389_v4 = vld [vmem:[%s203_s9 + $0x8] sm:$0xff]  ;;  %v206_v5 = vld [vmem:[%s198_s21] sm:$0xff]  ;;  %v208_v7 = vld [vmem:[%s198_s21 + $0x10] sm:$0xff]  ;;  %s193_s7 = scalar_lea.vmem [#allocation2], %s3194_s6  ;;  %s4861_s16 = scalar_lea.sflag [#allocation3], %s191_s5 }
  0x1e   : > { %v207_v6 = vld [vmem:[%s198_s21 + $0x8] sm:$0xff]  ;;  %v209_v9 = vld [vmem:[%s198_s21 + $0x18] sm:$0xff]  ;;  %v4400_v11 = vld [vmem:[%s203_s9 + $0x20] sm:$0xff]  ;;  %s3101_s11 = sshll.u32 %s193_s7, 4  ;;  %s4859_s11 = int_to_ptr.vmem [resolvable:$true] %s3101_s11 }
  0x1f   : > { %v4396_v8 = vpack.c.bf16 %v207_v6, %v206_v5  ;;  %v4398_v10 = vld [vmem:[%s203_s9 + $0x28] sm:$0xff]  ;;  %v4402_v12 = vpack.c.bf16 %v209_v9, %v208_v7  ;;  %v4408_v13 = vld [vmem:[%s203_s9 + $0x38] sm:$0xff]  ;;  %v4410_v14 = vld [vmem:[%s203_s9 + $0x30] sm:$0xff]  ;;  %s3098_s9 = sadd.s32 %s3434_s8, %s4372_s4  ;;  %s4171_s4 = scalar_lea.vmem %s4859_s11, 1024 }
  0x20   : > { %s3435_s10 = sshll.u32 %s3098_s9, 7  ;;  %p4172_p0 = scmp.ne.s32.totalorder %s4859_s11, %s4171_s4 }
  0x21   : > { %230 = vperm.xlu1 %4154, %v4387_v3   ;;  %224 = vperm.xlu0 %4153, %v4389_v4   ;;  %s4857_s21 = scalar_lea.hbm %s4916_s3, %s3435_s10  ;;  %p4178_p4 = scmp.lt.s32.totalorder %s4859_s11, %s4176_s27 }
  0x22   : > { %3935 = vmatprep.subr.bf16.mxu1 %v4396_v8  ;;  %p4173_p1 = pnand %p4172_p0, %p4351_p3  ;;  %p4179_p5 = scmp.lt.s32.totalorder %s4177_s28, %s4171_s4 }
  0x23   : > { %3937 = vmatpush3.bf16.msra.mxu1 %v4396_v8 }
  0x24   : > { %3939 = vmatprep.subr.bf16.mxu1 %v4402_v12  ;;  %p4174_p2 = pneg %p4173_p1  ;;  %p4180_p6 = por %p4179_p5, %p4178_p4 }
  0x25   : > { %236 = vperm.xlu1 %4154, %v4398_v10   ;;  %233 = vperm.xlu0 %4153, %v4400_v11  }
  0x26   : > { %p4181_p7 = pnand %p4180_p6, %p4174_p2 }
  0x27   : > { %3941 = vmatpush3.bf16.msra.mxu1 %v4402_v12 }
  0x28   : > { %3943 = vmatprep.subr.bf16.mxu1 %v4396_v8 }
  0x29   : > { %242 = vperm.xlu1 %4154, %v4408_v13   ;;  %239 = vperm.xlu0 %4153, %v4410_v14  }
  0x2d   : > { %4156 = vset.pattern.permute.xlu1 %v4268_v15  ;;  %4155 = vset.pattern.permute.xlu0 %v4268_v15 }
  0x2e   : > { %403 = vperm.xlu1 %4156, %v4389_v4   ;;  %400 = vperm.xlu0 %4155, %v4382_v2  }
  0x32   : > { %406 = vperm.xlu1 %4156, %v4380_v1   ;;  %409 = vperm.xlu0 %4155, %v4387_v3  }
  0x36   : > { %412 = vperm.xlu1 %4156, %v4400_v11   ;;  %415 = vperm.xlu0 %4155, %v4398_v10  }
  0x3a   : > { %418 = vperm.xlu1 %4156, %v4410_v14   ;;  %421 = vperm.xlu0 %4155, %v4408_v13  }
  0x3e   : > { %4157 = vset.pattern.permute.xlu1 %v4269_v16  ;;  %4158 = vset.pattern.permute.xlu0 %v4269_v16 }
  0x3f   : > { %845 = vperm.xlu1 %4157, %v4382_v2   ;;  %848 = vperm.xlu0 %4158, %v4389_v4  }
  0x43   : > { %851 = vperm.xlu1 %4157, %v4380_v1   ;;  %857 = vperm.xlu0 %4158, %v4400_v11  }
  0x47   : > { %854 = vperm.xlu1 %4157, %v4387_v3   ;;  %863 = vperm.xlu0 %4158, %v4410_v14  }
  0x4b   : > { %860 = vperm.xlu1 %4157, %v4398_v10   ;;  %4159 = vset.pattern.permute.xlu0 %v4270_v17 }
  0x4c   : > { %1164 = vperm.xlu0 %4159, %v4382_v2  }
  0x4f   : > { %866 = vperm.xlu1 %4157, %v4408_v13  }
  0x50   : > { %1173 = vperm.xlu0 %4159, %v4387_v3  }
  0x53   : > { %4160 = vset.pattern.permute.xlu1 %v4270_v17 }
  0x54   : > { %1167 = vperm.xlu1 %4160, %v4389_v4   ;;  %1179 = vperm.xlu0 %4159, %v4398_v10  }
  0x58   : > { %1170 = vperm.xlu1 %4160, %v4380_v1   ;;  %1185 = vperm.xlu0 %4159, %v4408_v13  }
  0x5c   : > { %1176 = vperm.xlu1 %4160, %v4400_v11   ;;  %4162 = vset.pattern.permute.xlu0 %v4271_v18 }
  0x5d   : > { %1486 = vperm.xlu0 %4162, %v4389_v4  }
  0x60   : > { %1182 = vperm.xlu1 %4160, %v4410_v14  }
  0x61   : > { %1495 = vperm.xlu0 %4162, %v4400_v11  }
  0x64   : > { %4161 = vset.pattern.permute.xlu1 %v4271_v18 }
  0x65   : > { %1483 = vperm.xlu1 %4161, %v4382_v2   ;;  %1501 = vperm.xlu0 %4162, %v4410_v14  }
  0x69   : > { %1489 = vperm.xlu1 %4161, %v4380_v1   ;;  %4163 = vset.pattern.permute.xlu0 %v4272_v19 }
  0x6a   : > { %1802 = vperm.xlu0 %4163, %v4382_v2  }
  0x6d   : > { %1492 = vperm.xlu1 %4161, %v4387_v3  }
  0x6e   : > { %1811 = vperm.xlu0 %4163, %v4387_v3  }
  0x71   : > { %1498 = vperm.xlu1 %4161, %v4398_v10  }
  0x72   : > { %1817 = vperm.xlu0 %4163, %v4398_v10  }
  0x75   : > { %1504 = vperm.xlu1 %4161, %v4408_v13  }
  0x76   : > { %1823 = vperm.xlu0 %4163, %v4408_v13  }
  0x79   : > { %4164 = vset.pattern.permute.xlu1 %v4272_v19 }
  0x7a   : > { %1805 = vperm.xlu1 %4164, %v4389_v4   ;;  %4166 = vset.pattern.permute.xlu0 %v4273_v20 }
  0x7b   : > { %2124 = vperm.xlu0 %4166, %v4389_v4  }
  0x7e   : > { %1808 = vperm.xlu1 %4164, %v4380_v1  }
  0x7f   : > { %2133 = vperm.xlu0 %4166, %v4400_v11  }
  0x82   : > { %1814 = vperm.xlu1 %4164, %v4400_v11  }
  0x83   : > { %2139 = vperm.xlu0 %4166, %v4410_v14  }
  0x86   : > { %1820 = vperm.xlu1 %4164, %v4410_v14  }
  0x87   : > { %4167 = vset.pattern.permute.xlu0 %v4274_v21 }
  0x88   : > { %2440 = vperm.xlu0 %4167, %v4382_v2  }
  0x8a   : > { %4165 = vset.pattern.permute.xlu1 %v4273_v20 }
  0x8b   : > { %2121 = vperm.xlu1 %4165, %v4382_v2  }
  0x8c   : > { %2449 = vperm.xlu0 %4167, %v4387_v3  }
  0x8f   : > { %2127 = vperm.xlu1 %4165, %v4380_v1  }
  0x90   : > { %2455 = vperm.xlu0 %4167, %v4398_v10  }
  0x93   : > { %2130 = vperm.xlu1 %4165, %v4387_v3  }
  0x94   : > { %2461 = vperm.xlu0 %4167, %v4408_v13  }
  0x97   : > { %2136 = vperm.xlu1 %4165, %v4398_v10  }
  0x98   : > { %4170 = vset.pattern.permute.xlu0 %v4275_v23 }
  0x99   : > { %2762 = vperm.xlu0 %4170, %v4389_v4  }
  0x9b   : > { %2142 = vperm.xlu1 %4165, %v4408_v13  }
  0x9c   : > { %v228_v25 = vpop.permute.xlu1 %227  ;;  %v222_v26 = vpop.permute.xlu0 %221 }
  0x9d   : > { %vm244_vm1 = vcmp.eq.s32.totalorder %v222_v26, %v4470_v24  ;;  %2771 = vperm.xlu0 %4170, %v4400_v11   ;;  %vm246_vm2 = vcmp.eq.s32.totalorder %v228_v25, %v4470_v24 }
  0x9e   : > { %v3199_v28 = vsel %vm244_vm1, 1.0, %v4276_v27  ;;  %v3201_v32 = vsel %vm246_vm2, 1.0, %v4276_v27 }
  0x9f   : > { %4168 = vset.pattern.permute.xlu1 %v4274_v21  ;;  %3636 = vmatprep.mubr.msk.f32.mxu1 %vm268_vm0, %v3199_v28 }
  0xa0   : > { %v231_v29 = vpop.permute.xlu1 %230  ;;  %2443 = vperm.xlu1 %4168, %v4389_v4   ;;  %v225_v30 = vpop.permute.xlu0 %224 }
  0xa1   : > { %vm245_vm3 = vcmp.eq.s32.totalorder %v225_v30, %v4470_v24  ;;  %2777 = vperm.xlu0 %4170, %v4410_v14   ;;  %vm247_vm4 = vcmp.eq.s32.totalorder %v231_v29, %v4470_v24 }
  0xa2   : > { %v3200_v31 = vsel %vm245_vm3, 1.0, %v4276_v27  ;;  %v3202_v35 = vsel %vm247_vm4, 1.0, %v4276_v27 }
  0xa3   : > { %3637 = vmatmul.mubr.msk.f32.vlgmr.msra.gmra.mrb[0].mxu1 %vm268_vm0, %v3200_v31 }
  0xa4   : > { %v237_v33 = vpop.permute.xlu1 %236  ;;  %2446 = vperm.xlu1 %4168, %v4380_v1   ;;  %v234_v34 = vpop.permute.xlu0 %233  ;;  %3639 = vmatprep.mubr.msk.f32.mxu1 %vm268_vm0, %v3201_v32 }
  0xa5   : > { %vm248_vm5 = vcmp.eq.s32.totalorder %v234_v34, %v4470_v24  ;;  %3945 = vmatpush3.bf16.msra.mxu1 %v4396_v8  ;;  %vm249_vm6 = vcmp.eq.s32.totalorder %v237_v33, %v4470_v24 }
  0xa6   : > { %v3203_v36 = vsel %vm248_vm5, 1.0, %v4276_v27  ;;  %3947 = vmatprep.subr.bf16.mxu1 %v4402_v12  ;;  %v3204_v39 = vsel %vm249_vm6, 1.0, %v4276_v27 }
  0xa7   : > { %3640 = vmatmul.mubr.msk.f32.gmra.mrb[2].mxu1 %vm268_vm0, %v3202_v35 }
  0xa8   : > { %v243_v37 = vpop.permute.xlu1 %242  ;;  %2452 = vperm.xlu1 %4168, %v4400_v11   ;;  %v240_v38 = vpop.permute.xlu0 %239  ;;  %3642 = vmatprep.mubr.msk.f32.mxu1 %vm268_vm0, %v3203_v36 }
  0xa9   : > { %vm250_vm7 = vcmp.eq.s32.totalorder %v240_v38, %v4470_v24  ;;  %3949 = vmatpush3.bf16.msra.mxu1 %v4402_v12  ;;  %vm251_vm8 = vcmp.eq.s32.totalorder %v243_v37, %v4470_v24 }
  0xaa   : > { %v3205_v40 = vsel %vm250_vm7, 1.0, %v4276_v27  ;;  %3951 = vmatprep.subr.bf16.mxu1 %v4396_v8  ;;  %v3206_v43 = vsel %vm251_vm8, 1.0, %v4276_v27 }
  0xab   : > { %3643 = vmatmul.mubr.msk.f32.gmra.mrb[4].mxu1 %vm268_vm0, %v3204_v39 }
  0xac   : > { %2458 = vperm.xlu1 %4168, %v4410_v14   ;;  %3645 = vmatprep.mubr.msk.f32.mxu1 %vm268_vm0, %v3205_v40 }
  0xad   : > { %v404_v41 = vpop.permute.xlu1 %403  ;;  %v401_v42 = vpop.permute.xlu0 %400 }
  0xae   : > { %vm423_vm9 = vcmp.eq.s32.totalorder %v401_v42, %v4470_v24  ;;  %vm424_vm10 = vcmp.eq.s32.totalorder %v404_v41, %v4470_v24 }
  0xaf   : > { %v3215_v44 = vsel %vm423_vm9, 1.0, %v4276_v27  ;;  %3646 = vmatmul.mubr.msk.f32.gmra.mrb[6].mxu1 %vm268_vm0, %v3206_v43  ;;  %v3216_v47 = vsel %vm424_vm10, 1.0, %v4276_v27 }
  0xb0   : > { %4169 = vset.pattern.permute.xlu1 %v4275_v23  ;;  %3656 = vmatprep.mubr.msk.f32.mxu1 %vm268_vm0, %v3215_v44 }
  0xb1   : > { %v407_v45 = vpop.permute.xlu1 %406  ;;  %2759 = vperm.xlu1 %4169, %v4382_v2   ;;  %v410_v46 = vpop.permute.xlu0 %409 }
  0xb2   : > { %vm425_vm11 = vcmp.eq.s32.totalorder %v407_v45, %v4470_v24  ;;  %vm426_vm12 = vcmp.eq.s32.totalorder %v410_v46, %v4470_v24 }
  0xb3   : > { %v3217_v48 = vsel %vm425_vm11, 1.0, %v4276_v27  ;;  %3657 = vmatmul.mubr.msk.f32.vlgmr.msra.gmra.mrb[8].mxu1 %vm268_vm0, %v3216_v47  ;;  %v3218_v49 = vsel %vm426_vm12, 1.0, %v4276_v27 }
  0xb4   : > { %3659 = vmatprep.mubr.msk.f32.mxu1 %vm268_vm0, %v3217_v48  ;;  %3953 = vmatpush3.bf16.msra.mxu1 %v4396_v8 }
  0xb5   : > { %v413_v50 = vpop.permute.xlu1 %412  ;;  %2765 = vperm.xlu1 %4169, %v4380_v1   ;;  %v416_v51 = vpop.permute.xlu0 %415  ;;  %3955 = vmatprep.subr.bf16.mxu1 %v4402_v12 }
  0xb6   : > { %vm427_vm13 = vcmp.eq.s32.totalorder %v413_v50, %v4470_v24  ;;  %vm428_vm14 = vcmp.eq.s32.totalorder %v416_v51, %v4470_v24 }
  0xb7   : > { %v3219_v52 = vsel %vm427_vm13, 1.0, %v4276_v27  ;;  %3660 = vmatmul.mubr.msk.f32.gmra.mrb[10].mxu1 %vm268_vm0, %v3218_v49  ;;  %v3220_v55 = vsel %vm428_vm14, 1.0, %v4276_v27 }
  0xb8   : > { %3662 = vmatprep.mubr.msk.f32.mxu1 %vm268_vm0, %v3219_v52  ;;  %3957 = vmatpush3.bf16.msra.mxu1 %v4402_v12 }
  0xb9   : > { %v419_v53 = vpop.permute.xlu1 %418  ;;  %2768 = vperm.xlu1 %4169, %v4387_v3   ;;  %v422_v54 = vpop.permute.xlu0 %421  ;;  %3959 = vmatprep.subr.bf16.mxu1 %v4396_v8 }
  0xba   : > { %vm429_vm15 = vcmp.eq.s32.totalorder %v419_v53, %v4470_v24  ;;  %vm430_vm1 = vcmp.eq.s32.totalorder %v422_v54, %v4470_v24 }
  0xbb   : > { %v3221_v56 = vsel %vm429_vm15, 1.0, %v4276_v27  ;;  %3663 = vmatmul.mubr.msk.f32.gmra.mrb[12].mxu1 %vm268_vm0, %v3220_v55  ;;  %v3222_v57 = vsel %vm430_vm1, 1.0, %v4276_v27 }
  0xbc   : > { %3665 = vmatprep.mubr.msk.f32.mxu1 %vm268_vm0, %v3221_v56 }
  0xbd   : > { %2774 = vperm.xlu1 %4169, %v4398_v10  }
  0xbe   : > { %v846_v58 = vpop.permute.xlu1 %845  ;;  %v849_v59 = vpop.permute.xlu0 %848 }
  0xbf   : > { %vm868_vm2 = vcmp.eq.s32.totalorder %v846_v58, %v4470_v24  ;;  %3666 = vmatmul.mubr.msk.f32.gmra.mrb[14].mxu1 %vm268_vm0, %v3222_v57  ;;  %vm869_vm3 = vcmp.eq.s32.totalorder %v849_v59, %v4470_v24 }
  0xc0   : > { %v3250_v60 = vsel %vm868_vm2, 1.0, %v4276_v27  ;;  %v3251_v61 = vsel %vm869_vm3, 1.0, %v4276_v27 }
  0xc1   : > { %2780 = vperm.xlu1 %4169, %v4408_v13   ;;  %3704 = vmatprep.mubr.msk.f32.mxu1 %vm268_vm0, %v3250_v60 }
  0xc2   : > { %v852_v62 = vpop.permute.xlu1 %851  ;;  %v858_v63 = vpop.permute.xlu0 %857 }
  0xc3   : > { %vm870_vm4 = vcmp.eq.s32.totalorder %v852_v62, %v4470_v24  ;;  %3705 = vmatmul.mubr.msk.f32.vlgmr.msra.gmra.mrb[16].mxu1 %vm268_vm0, %v3251_v61  ;;  %vm872_vm5 = vcmp.eq.s32.totalorder %v858_v63, %v4470_v24  ;;  %v3231_v61 = vld [vmem:[%s4915_s2 + $0x4] sm:$0xf] }
  0xc4   : > { %v3252_v0 = vsel %vm870_vm4, 1.0, %v4276_v27  ;;  %3961 = vmatpush3.bf16.msra.mxu1 %v4396_v8  ;;  %v3254_v3 = vsel %vm872_vm5, 1.0, %v4276_v27 }
  0xc5   : > { %3707 = vmatprep.mubr.msk.f32.mxu1 %vm268_vm0, %v3252_v0  ;;  %3963 = vmatprep.subr.bf16.mxu1 %v4402_v12 }
  0xc6   : > { %v855_v1 = vpop.permute.xlu1 %854  ;;  %v864_v2 = vpop.permute.xlu0 %863 }
  0xc7   : > { %vm871_vm6 = vcmp.eq.s32.totalorder %v855_v1, %v4470_v24  ;;  %vm874_vm7 = vcmp.eq.s32.totalorder %v864_v2, %v4470_v24 }
  0xc8   : > { %v3253_v4 = vsel %vm871_vm6, 1.0, %v4276_v27  ;;  %3965 = vmatpush3.bf16.msra.mxu1 %v4402_v12  ;;  %v3256_v6 = vsel %vm874_vm7, 1.0, %v4276_v27 }
  0xc9   : > { %3708 = vmatmul.mubr.msk.f32.gmra.mrb[18].mxu1 %vm268_vm0, %v3253_v4  ;;  %3967 = vmatprep.subr.bf16.mxu1 %v4396_v8  ;;  %v4663_v4 = vld [vmem:[%s4915_s2] sm:$0xf] }
  0xca   : > { %v861_v5 = vpop.permute.xlu1 %860  ;;  %3710 = vmatprep.mubr.msk.f32.mxu1 %vm268_vm0, %v3254_v3 }
  0xcb   : > { %vm873_vm8 = vcmp.eq.s32.totalorder %v861_v5, %v4470_v24  ;;  %v1165_v7 = vpop.permute.xlu0 %1164 }
  0xcc   : > { %v3255_v9 = vsel %vm873_vm8, 1.0, %v4276_v27  ;;  %vm1187_vm9 = vcmp.eq.s32.totalorder %v1165_v7, %v4470_v24 }
  0xcd   : > { %3711 = vmatmul.mubr.msk.f32.gmra.mrb[20].mxu1 %vm268_vm0, %v3255_v9  ;;  %v3276_v11 = vsel %vm1187_vm9, 1.0, %v4276_v27 }
  0xce   : > { %v867_v10 = vpop.permute.xlu1 %866  ;;  %3713 = vmatprep.mubr.msk.f32.mxu1 %vm268_vm0, %v3256_v6 }
  0xcf   : > { %vm875_vm10 = vcmp.eq.s32.totalorder %v867_v10, %v4470_v24  ;;  %v1174_v13 = vpop.permute.xlu0 %1173 }
  0xd0   : > { %v3257_v14 = vsel %vm875_vm10, 1.0, %v4276_v27  ;;  %vm1190_vm12 = vcmp.eq.s32.totalorder %v1174_v13, %v4470_v24 }
  0xd1   : > { %3714 = vmatmul.mubr.msk.f32.gmra.mrb[22].mxu1 %vm268_vm0, %v3257_v14  ;;  %v3279_v19 = vsel %vm1190_vm12, 1.0, %v4276_v27 }
  0xd2   : > { %3738 = vmatprep.mubr.msk.f32.mxu1 %vm268_vm0, %v3276_v11 }
  0xd3   : > { %v1168_v15 = vpop.permute.xlu1 %1167  ;;  %v1180_v16 = vpop.permute.xlu0 %1179 }
  0xd4   : > { %vm1188_vm11 = vcmp.eq.s32.totalorder %v1168_v15, %v4470_v24  ;;  %vm1192_vm14 = vcmp.eq.s32.totalorder %v1180_v16, %v4470_v24 }
  0xd5   : > { %v3277_v17 = vsel %vm1188_vm11, 1.0, %v4276_v27  ;;  %v3281_v23 = vsel %vm1192_vm14, 1.0, %v4276_v27 }
  0xd6   : > { %3739 = vmatmul.mubr.msk.f32.vlgmr.msra.gmra.mrb[24].mxu1 %vm268_vm0, %v3277_v17 }
  0xd7   : > { %v1171_v18 = vpop.permute.xlu1 %1170  ;;  %3969 = vmatpush3.bf16.msra.mxu1 %v4396_v8  ;;  %v1186_v20 = vpop.permute.xlu0 %1185 }
  0xd8   : > { %vm1189_vm13 = vcmp.eq.s32.totalorder %v1171_v18, %v4470_v24  ;;  %3971 = vmatprep.subr.bf16.mxu1 %v4402_v12  ;;  %vm1194_vm1 = vcmp.eq.s32.totalorder %v1186_v20, %v4470_v24 }
  0xd9   : > { %v3278_v21 = vsel %vm1189_vm13, 1.0, %v4276_v27  ;;  %v3283_v29 = vsel %vm1194_vm1, 1.0, %v4276_v27 }
  0xda   : > { %3741 = vmatprep.mubr.msk.f32.mxu1 %vm268_vm0, %v3278_v21 }
  0xdb   : > { %v1177_v22 = vpop.permute.xlu1 %1176  ;;  %3742 = vmatmul.mubr.msk.f32.gmra.mrb[26].mxu1 %vm268_vm0, %v3279_v19 }
  0xdc   : > { %vm1191_vm15 = vcmp.eq.s32.totalorder %v1177_v22, %v4470_v24  ;;  %3973 = vmatpush3.bf16.msra.mxu1 %v4402_v12  ;;  %v1487_v26 = vpop.permute.xlu0 %1486 }
  0xdd   : > { %v3280_v25 = vsel %vm1191_vm15, 1.0, %v4276_v27  ;;  %3975 = vmatprep.subr.bf16.mxu1 %v4396_v8  ;;  %vm1507_vm3 = vcmp.eq.s32.totalorder %v1487_v26, %v4470_v24 }
  0xde   : > { %3744 = vmatprep.mubr.msk.f32.mxu1 %vm268_vm0, %v3280_v25  ;;  %v3303_v33 = vsel %vm1507_vm3, 1.0, %v4276_v27 }
  0xdf   : > { %v1183_v28 = vpop.permute.xlu1 %1182  ;;  %3745 = vmatmul.mubr.msk.f32.gmra.mrb[28].mxu1 %vm268_vm0, %v3281_v23 }
  0xe0   : > { %vm1193_vm2 = vcmp.eq.s32.totalorder %v1183_v28, %v4470_v24  ;;  %v1496_v31 = vpop.permute.xlu0 %1495 }
  0xe1   : > { %v3282_v30 = vsel %vm1193_vm2, 1.0, %v4276_v27  ;;  %vm1510_vm6 = vcmp.eq.s32.totalorder %v1496_v31, %v4470_v24 }
  0xe2   : > { %3747 = vmatprep.mubr.msk.f32.mxu1 %vm268_vm0, %v3282_v30  ;;  %v3306_v39 = vsel %vm1510_vm6, 1.0, %v4276_v27 }
  0xe3   : > { %3748 = vmatmul.mubr.msk.f32.gmra.mrb[30].mxu1 %vm268_vm0, %v3283_v29 }
  0xe4   : > { %v1484_v32 = vpop.permute.xlu1 %1483  ;;  %v1502_v36 = vpop.permute.xlu0 %1501 }
  0xe5   : > { %vm1506_vm4 = vcmp.eq.s32.totalorder %v1484_v32, %v4470_v24  ;;  %vm1512_vm8 = vcmp.eq.s32.totalorder %v1502_v36, %v4470_v24 }
  0xe6   : > { %v3302_v34 = vsel %vm1506_vm4, 1.0, %v4276_v27  ;;  %v3308_v43 = vsel %vm1512_vm8, 1.0, %v4276_v27  ;;  %vm603_vm4 = vcmask 1043456  }
  0xe7   : > { %3772 = vmatprep.mubr.msk.f32.mxu1 %vm268_vm0, %v3302_v34  ;;  %3668 = vmatprep.subr.msk.mxu0 %vm603_vm4, %v3231_v61 }
  0xe8   : > { %v1490_v35 = vpop.permute.xlu1 %1489  ;;  %3773 = vmatmul.mubr.msk.f32.vlgmr.msra.gmra.mrb[32].mxu1 %vm268_vm0, %v3303_v33  ;;  %3669 = vmatpush3.msk.msra.mxu0 %vm603_vm4, %v3231_v61 }
  0xe9   : > { %vm1508_vm5 = vcmp.eq.s32.totalorder %v1490_v35, %v4470_v24  ;;  %3977 = vmatpush3.bf16.msra.mxu1 %v4396_v8  ;;  %v1803_v41 = vpop.permute.xlu0 %1802  ;;  %3682 = vmatprep.subr.msk.mxu0 %vm603_vm4, %v4663_v4 }
  0xea   : > { %v3304_v37 = vsel %vm1508_vm5, 1.0, %v4276_v27  ;;  %3979 = vmatprep.subr.bf16.mxu1 %v4402_v12  ;;  %vm1825_vm10 = vcmp.eq.s32.totalorder %v1803_v41, %v4470_v24 }
  0xeb   : > { %3775 = vmatprep.mubr.msk.f32.mxu1 %vm268_vm0, %v3304_v37  ;;  %v3328_v47 = vsel %vm1825_vm10, 1.0, %v4276_v27 }
  0xec   : > { %v1493_v38 = vpop.permute.xlu1 %1492 }
  0xed   : > { %vm1509_vm7 = vcmp.eq.s32.totalorder %v1493_v38, %v4470_v24  ;;  %3981 = vmatpush3.bf16.msra.mxu1 %v4402_v12  ;;  %v1812_v46 = vpop.permute.xlu0 %1811 }
  0xee   : > { %v3305_v40 = vsel %vm1509_vm7, 1.0, %v4276_v27  ;;  %3983 = vmatprep.subr.bf16.mxu1 %v4396_v8  ;;  %vm1828_vm13 = vcmp.eq.s32.totalorder %v1812_v46, %v4470_v24 }
  0xef   : > { %3776 = vmatmul.mubr.msk.f32.gmra.mrb[34].mxu1 %vm268_vm0, %v3305_v40  ;;  %v3331_v53 = vsel %vm1828_vm13, 1.0, %v4276_v27 }
  0xf0   : > { %v1499_v42 = vpop.permute.xlu1 %1498  ;;  %3778 = vmatprep.mubr.msk.f32.mxu1 %vm268_vm0, %v3306_v39 }
  0xf1   : > { %vm1511_vm9 = vcmp.eq.s32.totalorder %v1499_v42, %v4470_v24  ;;  %v1818_v50 = vpop.permute.xlu0 %1817 }
  0xf2   : > { %v3307_v44 = vsel %vm1511_vm9, 1.0, %v4276_v27  ;;  %vm1830_vm15 = vcmp.eq.s32.totalorder %v1818_v50, %v4470_v24 }
  0xf3   : > { %3779 = vmatmul.mubr.msk.f32.gmra.mrb[36].mxu1 %vm268_vm0, %v3307_v44  ;;  %v3333_v57 = vsel %vm1830_vm15, 1.0, %v4276_v27 }
  0xf4   : > { %v1505_v45 = vpop.permute.xlu1 %1504  ;;  %3781 = vmatprep.mubr.msk.f32.mxu1 %vm268_vm0, %v3308_v43 }
  0xf5   : > { %vm1513_vm11 = vcmp.eq.s32.totalorder %v1505_v45, %v4470_v24  ;;  %v1824_v55 = vpop.permute.xlu0 %1823 }
  0xf6   : > { %v3309_v48 = vsel %vm1513_vm11, 1.0, %v4276_v27  ;;  %vm1832_vm2 = vcmp.eq.s32.totalorder %v1824_v55, %v4470_v24 }
  0xf7   : > { %3782 = vmatmul.mubr.msk.f32.gmra.mrb[38].mxu1 %vm268_vm0, %v3309_v48  ;;  %v3335_v63 = vsel %vm1832_vm2, 1.0, %v4276_v27 }
  0xf8   : > { %3806 = vmatprep.mubr.msk.f32.mxu1 %vm268_vm0, %v3328_v47 }
  0xf9   : > { %v1806_v49 = vpop.permute.xlu1 %1805 }
  0xfa   : > { %vm1826_vm12 = vcmp.eq.s32.totalorder %v1806_v49, %v4470_v24  ;;  %v2125_v59 = vpop.permute.xlu0 %2124 }
  0xfb   : > { %v3329_v51 = vsel %vm1826_vm12, 1.0, %v4276_v27  ;;  %vm2145_vm5 = vcmp.eq.s32.totalorder %v2125_v59, %v4470_v24 }
  0xfc   : > { %3807 = vmatmul.mubr.msk.f32.vlgmr.msra.gmra.mrb[40].mxu1 %vm268_vm0, %v3329_v51  ;;  %v3355_v2 = vsel %vm2145_vm5, 1.0, %v4276_v27 }
  0xfd   : > { %v1809_v52 = vpop.permute.xlu1 %1808  ;;  %3985 = vmatpush3.bf16.msra.mxu1 %v4396_v8 }
  0xfe   : > { %vm1827_vm14 = vcmp.eq.s32.totalorder %v1809_v52, %v4470_v24  ;;  %3987 = vmatprep.subr.bf16.mxu1 %v4402_v12  ;;  %v2134_v1 = vpop.permute.xlu0 %2133 }
  0xff   : > { %v3330_v54 = vsel %vm1827_vm14, 1.0, %v4276_v27  ;;  %vm2148_vm8 = vcmp.eq.s32.totalorder %v2134_v1, %v4470_v24 }
 0x100   : > { %3809 = vmatprep.mubr.msk.f32.mxu1 %vm268_vm0, %v3330_v54  ;;  %v3358_v10 = vsel %vm2148_vm8, 1.0, %v4276_v27 }
 0x101   : > { %v1815_v56 = vpop.permute.xlu1 %1814  ;;  %3810 = vmatmul.mubr.msk.f32.gmra.mrb[42].mxu1 %vm268_vm0, %v3331_v53 }
 0x102   : > { %vm1829_vm1 = vcmp.eq.s32.totalorder %v1815_v56, %v4470_v24  ;;  %3989 = vmatpush3.bf16.msra.mxu1 %v4402_v12  ;;  %v2140_v7 = vpop.permute.xlu0 %2139 }
 0x103   : > { %v3332_v58 = vsel %vm1829_vm1, 1.0, %v4276_v27  ;;  %3991 = vmatprep.subr.bf16.mxu1 %v4396_v8  ;;  %vm2150_vm10 = vcmp.eq.s32.totalorder %v2140_v7, %v4470_v24 }
 0x104   : > { %3812 = vmatprep.mubr.msk.f32.mxu1 %vm268_vm0, %v3332_v58  ;;  %v3360_v16 = vsel %vm2150_vm10, 1.0, %v4276_v27 }
 0x105   : > { %v1821_v60 = vpop.permute.xlu1 %1820  ;;  %3813 = vmatmul.mubr.msk.f32.gmra.mrb[44].mxu1 %vm268_vm0, %v3333_v57 }
 0x106   : > { %vm1831_vm3 = vcmp.eq.s32.totalorder %v1821_v60, %v4470_v24 }
 0x107   : > { %v3334_v62 = vsel %vm1831_vm3, 1.0, %v4276_v27  ;;  %v2441_v14 = vpop.permute.xlu0 %2440 }
 0x108   : > { %3815 = vmatprep.mubr.msk.f32.mxu1 %vm268_vm0, %v3334_v62  ;;  %vm2463_vm12 = vcmp.eq.s32.totalorder %v2441_v14, %v4470_v24 }
 0x109   : > { %3816 = vmatmul.mubr.msk.f32.gmra.mrb[46].mxu1 %vm268_vm0, %v3335_v63  ;;  %v3380_v18 = vsel %vm2463_vm12, 1.0, %v4276_v27 }
 0x10a   : > { %v2122_v0 = vpop.permute.xlu1 %2121 }
 0x10b   : > { %vm2144_vm6 = vcmp.eq.s32.totalorder %v2122_v0, %v4470_v24  ;;  %v2450_v20 = vpop.permute.xlu0 %2449 }
 0x10c   : > { %v3354_v3 = vsel %vm2144_vm6, 1.0, %v4276_v27  ;;  %vm2466_vm15 = vcmp.eq.s32.totalorder %v2450_v20, %v4470_v24 }
 0x10d   : > { %3840 = vmatprep.mubr.msk.f32.mxu1 %vm268_vm0, %v3354_v3  ;;  %v3383_v26 = vsel %vm2466_vm15, 1.0, %v4276_v27  ;;  %vm578_vm15 = vcmask 31744   ;;  %v3292_v3 = vld [vmem:[%s4915_s2 + $0xc] sm:$0xf] }
 0x10e   : > { %v2128_v5 = vpop.permute.xlu1 %2127  ;;  %3841 = vmatmul.mubr.msk.f32.vlgmr.msra.gmra.mrb[48].mxu1 %vm268_vm0, %v3355_v2 }
 0x10f   : > { %vm2146_vm7 = vcmp.eq.s32.totalorder %v2128_v5, %v4470_v24  ;;  %3993 = vmatpush3.bf16.msra.mxu1 %v4396_v8  ;;  %v2456_v23 = vpop.permute.xlu0 %2455 }
 0x110   : > { %v3356_v6 = vsel %vm2146_vm7, 1.0, %v4276_v27  ;;  %3995 = vmatprep.subr.bf16.mxu1 %v4402_v12  ;;  %vm2468_vm2 = vcmp.eq.s32.totalorder %v2456_v23, %v4470_v24 }
 0x111   : > { %3843 = vmatprep.mubr.msk.f32.mxu1 %vm268_vm0, %v3356_v6  ;;  %v3385_v31 = vsel %vm2468_vm2, 1.0, %v4276_v27 }
 0x112   : > { %v2131_v9 = vpop.permute.xlu1 %2130 }
 0x113   : > { %vm2147_vm9 = vcmp.eq.s32.totalorder %v2131_v9, %v4470_v24  ;;  %3997 = vmatpush3.bf16.msra.mxu1 %v4402_v12  ;;  %v2462_v30 = vpop.permute.xlu0 %2461 }
 0x114   : > { %v3357_v11 = vsel %vm2147_vm9, 1.0, %v4276_v27  ;;  %3999 = vmatprep.subr.bf16.mxu1 %v4396_v8  ;;  %vm2470_vm5 = vcmp.eq.s32.totalorder %v2462_v30, %v4470_v24  ;;  %v3370_v30 = vld [vmem:[%s4915_s2 + $0x18] sm:$0xf] }
 0x115   : > { %3844 = vmatmul.mubr.msk.f32.gmra.mrb[50].mxu1 %vm268_vm0, %v3357_v11  ;;  %v3387_v35 = vsel %vm2470_vm5, 1.0, %v4276_v27  ;;  %v3318_v11 = vld [vmem:[%s4915_s2 + $0x10] sm:$0xf] }
 0x116   : > { %v2137_v13 = vpop.permute.xlu1 %2136  ;;  %3846 = vmatprep.mubr.msk.f32.mxu1 %vm268_vm0, %v3358_v10 }
 0x117   : > { %vm2149_vm11 = vcmp.eq.s32.totalorder %v2137_v13, %v4470_v24 }
 0x118   : > { %v3359_v15 = vsel %vm2149_vm11, 1.0, %v4276_v27  ;;  %v2763_v34 = vpop.permute.xlu0 %2762 }
 0x119   : > { %3847 = vmatmul.mubr.msk.f32.gmra.mrb[52].mxu1 %vm268_vm0, %v3359_v15  ;;  %vm2783_vm7 = vcmp.eq.s32.totalorder %v2763_v34, %v4470_v24 }
 0x11a   : > { %v2143_v17 = vpop.permute.xlu1 %2142  ;;  %3849 = vmatprep.mubr.msk.f32.mxu1 %vm268_vm0, %v3360_v16  ;;  %v3407_v36 = vsel %vm2783_vm7, 1.0, %v4276_v27 }
 0x11b   : > { %vm2151_vm13 = vcmp.eq.s32.totalorder %v2143_v17, %v4470_v24 }
 0x11c   : > { %v3361_v19 = vsel %vm2151_vm13, 1.0, %v4276_v27  ;;  %v2772_v38 = vpop.permute.xlu0 %2771 }
 0x11d   : > { %3850 = vmatmul.mubr.msk.f32.gmra.mrb[54].mxu1 %vm268_vm0, %v3361_v19  ;;  %vm2786_vm10 = vcmp.eq.s32.totalorder %v2772_v38, %v4470_v24 }
 0x11e   : > { %3874 = vmatprep.mubr.msk.f32.mxu1 %vm268_vm0, %v3380_v18  ;;  %v3410_v44 = vsel %vm2786_vm10, 1.0, %v4276_v27 }
 0x11f   : > { %v2444_v21 = vpop.permute.xlu1 %2443 }
 0x120   : > { %vm2464_vm14 = vcmp.eq.s32.totalorder %v2444_v21, %v4470_v24  ;;  %v2778_v42 = vpop.permute.xlu0 %2777  ;;  %v3344_v21 = vld [vmem:[%s4915_s2 + $0x14] sm:$0xf] }
 0x121   : > { %v3381_v22 = vsel %vm2464_vm14, 1.0, %v4276_v27  ;;  %vm2788_vm12 = vcmp.eq.s32.totalorder %v2778_v42, %v4470_v24 }
 0x122   : > { %3875 = vmatmul.mubr.msk.f32.vlgmr.msra.gmra.mrb[56].mxu1 %vm268_vm0, %v3381_v22  ;;  %v3412_v47 = vsel %vm2788_vm12, 1.0, %v4276_v27 }
 0x123   : > { %v2447_v25 = vpop.permute.xlu1 %2446  ;;  %4001 = vmatpush3.bf16.msra.mxu1 %v4396_v8 }
 0x124   : > { %vm2465_vm1 = vcmp.eq.s32.totalorder %v2447_v25, %v4470_v24  ;;  %4003 = vmatprep.subr.bf16.mxu1 %v4402_v12 }
 0x125   : > { %v3382_v28 = vsel %vm2465_vm1, 1.0, %v4276_v27 }
 0x126   : > { %3877 = vmatprep.mubr.msk.f32.mxu1 %vm268_vm0, %v3382_v28 }
 0x127   : > { %v2453_v29 = vpop.permute.xlu1 %2452  ;;  %3878 = vmatmul.mubr.msk.f32.gmra.mrb[58].mxu1 %vm268_vm0, %v3383_v26 }
 0x128   : > { %vm2467_vm3 = vcmp.eq.s32.totalorder %v2453_v29, %v4470_v24  ;;  %4005 = vmatpush3.bf16.msra.mxu1 %v4402_v12 }
 0x129   : > { %v3384_v8 = vsel %vm2467_vm3, 1.0, %v4276_v27 }
 0x12a   : > { %3880 = vmatprep.mubr.msk.f32.mxu1 %vm268_vm0, %v3384_v8 }
 0x12b   : > { %v2459_v32 = vpop.permute.xlu1 %2458  ;;  %3881 = vmatmul.mubr.msk.f32.gmra.mrb[60].mxu1 %vm268_vm0, %v3385_v31 }
 0x12c   : > { %vm2469_vm6 = vcmp.eq.s32.totalorder %v2459_v32, %v4470_v24 }
 0x12d   : > { %v3386_v33 = vsel %vm2469_vm6, 1.0, %v4276_v27 }
 0x12e   : > { %3883 = vmatprep.mubr.msk.f32.mxu1 %vm268_vm0, %v3386_v33 }
 0x12f   : > { %3884 = vmatmul.mubr.msk.f32.gmra.mrb[62].mxu1 %vm268_vm0, %v3387_v35 }
 0x130   : > { %v2760_v12 = vpop.permute.xlu1 %2759 }
 0x131   : > { %vm2782_vm8 = vcmp.eq.s32.totalorder %v2760_v12, %v4470_v24 }
 0x132   : > { %v3406_v37 = vsel %vm2782_vm8, 1.0, %v4276_v27 }
 0x133   : > { %3908 = vmatprep.mubr.msk.f32.mxu1 %vm268_vm0, %v3406_v37 }
 0x134   : > { %v2766_v39 = vpop.permute.xlu1 %2765  ;;  %3909 = vmatmul.mubr.msk.f32.vlgmr.msra.gmra.mrb[64].mxu1 %vm268_vm0, %v3407_v36  ;;  %v3396_v36 = vld [vmem:[%s4915_s2 + $0x1c] sm:$0xf] }
 0x135   : > { %vm2784_vm9 = vcmp.eq.s32.totalorder %v2766_v39, %v4470_v24 }
 0x136   : > { %v3408_v40 = vsel %vm2784_vm9, 1.0, %v4276_v27 }
 0x137   : > { %3911 = vmatprep.mubr.msk.f32.mxu1 %vm268_vm0, %v3408_v40 }
 0x138   : > { %v2769_v41 = vpop.permute.xlu1 %2768 }
 0x139   : > { %vm2785_vm11 = vcmp.eq.s32.totalorder %v2769_v41, %v4470_v24 }
 0x13a   : > { %v3409_v43 = vsel %vm2785_vm11, 1.0, %v4276_v27 }
 0x13b   : > { %3912 = vmatmul.mubr.msk.f32.gmra.mrb[66].mxu1 %vm268_vm0, %v3409_v43  ;;  %v3422_v43 = vld [vmem:[%s4915_s2 + $0x20] sm:$0xf] }
 0x13c   : > { %v2775_v45 = vpop.permute.xlu1 %2774  ;;  %3914 = vmatprep.mubr.msk.f32.mxu1 %vm268_vm0, %v3410_v44 }
 0x13d   : > { %vm2787_vm13 = vcmp.eq.s32.totalorder %v2775_v45, %v4470_v24 }
 0x13e   : > { %v3411_v46 = vsel %vm2787_vm13, 1.0, %v4276_v27 }
 0x13f   : > { %3915 = vmatmul.mubr.msk.f32.gmra.mrb[68].mxu1 %vm268_vm0, %v3411_v46 }
 0x140   : > { %v2781_v48 = vpop.permute.xlu1 %2780  ;;  %3917 = vmatprep.mubr.msk.f32.mxu1 %vm268_vm0, %v3412_v47 }
 0x141   : > { %vm2789_vm14 = vcmp.eq.s32.totalorder %v2781_v48, %v4470_v24  ;;  %v3266_v24 = vld [vmem:[%s4915_s2 + $0x8] sm:$0xf] }
 0x142   : > { %v3413_v49 = vsel %vm2789_vm14, 1.0, %v4276_v27 }
 0x143   : > { %3918 = vmatmul.mubr.msk.f32.gmra.mrb[70].mxu1 %vm268_vm0, %v3413_v49 }
 0x176   : > { %v3638_v50 = vpop.f32.mrb[0].mxu1 }
 0x177   : > { %v359_v51 = vpop.f32.mrb[1].mxu1 }
 0x17a   : > { %v3641_v52 = vpop.f32.mrb[2].mxu1 }
 0x17b   : > { %v369_v53 = vpop.f32.mrb[3].mxu1 }
 0x17e   : > { %v3644_v54 = vpop.f32.mrb[4].mxu1 }
 0x17f   : > { %v379_v55 = vpop.f32.mrb[5].mxu1 }
 0x182   : > { %v3647_v56 = vpop.f32.mrb[6].mxu1 }
 0x183   : > { %v389_v57 = vpop.f32.mrb[7].mxu1 }
 0x186   : > { %v3658_v58 = vpop.f32.mrb[8].mxu1 }
 0x187   : > { %v537_v59 = vpop.f32.mrb[9].mxu1 }
 0x188   : > { %3670 = vmatprep.mubr.msk.f32.mxu0 %vm578_vm15, %v537_v59 }
 0x189   : > { %3671 = vmatmul.mubr.msk.f32.vlgmr.msra.gmra.mrb[0].mxu0 %vm578_vm15, %v3658_v58 }
 0x18a   : > { %v3661_v27 = vpop.f32.mrb[10].mxu1  ;;  %3683 = vmatpush3.msk.msra.mxu0 %vm603_vm4, %v4663_v4 }
 0x18b   : > { %v547_v60 = vpop.f32.mrb[11].mxu1  ;;  %3716 = vmatprep.subr.msk.mxu0 %vm603_vm4, %v3266_v24 }
 0x18c   : > { %3673 = vmatprep.mubr.msk.f32.mxu0 %vm578_vm15, %v547_v60 }
 0x18d   : > { %3674 = vmatmul.mubr.msk.f32.gmra.mrb[2].mxu0 %vm578_vm15, %v3661_v27 }
 0x18e   : > { %v3664_v61 = vpop.f32.mrb[12].mxu1 }
 0x18f   : > { %v557_v62 = vpop.f32.mrb[13].mxu1 }
 0x190   : > { %3676 = vmatprep.mubr.msk.f32.mxu0 %vm578_vm15, %v557_v62 }
 0x191   : > { %3677 = vmatmul.mubr.msk.f32.gmra.mrb[4].mxu0 %vm578_vm15, %v3664_v61 }
 0x192   : > { %v3667_v63 = vpop.f32.mrb[14].mxu1 }
 0x193   : > { %v567_v0 = vpop.f32.mrb[15].mxu1 }
 0x194   : > { %3679 = vmatprep.mubr.msk.f32.mxu0 %vm578_vm15, %v567_v0 }
 0x195   : > { %3680 = vmatmul.mubr.msk.f32.gmra.mrb[6].mxu0 %vm578_vm15, %v3667_v63 }
 0x196   : > { %3684 = vmatprep.mubr.msk.f32.mxu0 %vm578_vm15, %v359_v51  ;;  %v3706_v1 = vpop.f32.mrb[16].mxu1 }
 0x197   : > { %v982_v2 = vpop.f32.mrb[17].mxu1 }
 0x199   : > { %3685 = vmatmul.mubr.msk.f32.vlgmr.msra.gmra.mrb[0].mxu0 %vm578_vm15, %v3638_v50 }
 0x19a   : > { %3687 = vmatprep.mubr.msk.f32.mxu0 %vm578_vm15, %v369_v53  ;;  %3717 = vmatpush3.msk.msra.mxu0 %vm603_vm4, %v3266_v24 }
 0x19b   : > { %3750 = vmatprep.subr.msk.mxu0 %vm603_vm4, %v3292_v3 }
 0x19c   : > { %v3709_v4 = vpop.f32.mrb[18].mxu1 }
 0x19d   : > { %3688 = vmatmul.mubr.msk.f32.gmra.mrb[2].mxu0 %vm578_vm15, %v3641_v52  ;;  %v992_v5 = vpop.f32.mrb[19].mxu1 }
 0x19e   : > { %3690 = vmatprep.mubr.msk.f32.mxu0 %vm578_vm15, %v379_v55 }
 0x1a0   : > { %v3712_v6 = vpop.f32.mrb[20].mxu1 }
 0x1a1   : > { %3691 = vmatmul.mubr.msk.f32.gmra.mrb[4].mxu0 %vm578_vm15, %v3644_v54  ;;  %v1002_v7 = vpop.f32.mrb[21].mxu1 }
 0x1a2   : > { %3693 = vmatprep.mubr.msk.f32.mxu0 %vm578_vm15, %v389_v57 }
 0x1a4   : > { %v3715_v9 = vpop.f32.mrb[22].mxu1 }
 0x1a5   : > { %3694 = vmatmul.mubr.msk.f32.gmra.mrb[6].mxu0 %vm578_vm15, %v3647_v56  ;;  %v1012_v10 = vpop.f32.mrb[23].mxu1 }
 0x1a6   : > { %3718 = vmatprep.mubr.msk.f32.mxu0 %vm578_vm15, %v982_v2 }
 0x1a9   : > { %3719 = vmatmul.mubr.msk.f32.vlgmr.msra.gmra.mrb[0].mxu0 %vm578_vm15, %v3706_v1  ;;  %v3740_v13 = vpop.f32.mrb[24].mxu1 }
 0x1aa   : > { %3721 = vmatprep.mubr.msk.f32.mxu0 %vm578_vm15, %v992_v5  ;;  %v1301_v14 = vpop.f32.mrb[25].mxu1  ;;  %3751 = vmatpush3.msk.msra.mxu0 %vm603_vm4, %v3292_v3 }
 0x1ab   : > { %3784 = vmatprep.subr.msk.mxu0 %vm603_vm4, %v3318_v11 }
 0x1ad   : > { %3722 = vmatmul.mubr.msk.f32.gmra.mrb[2].mxu0 %vm578_vm15, %v3709_v4 }
 0x1ae   : > { %3724 = vmatprep.mubr.msk.f32.mxu0 %vm578_vm15, %v1002_v7  ;;  %v3743_v15 = vpop.f32.mrb[26].mxu1 }
 0x1af   : > { %v1311_v16 = vpop.f32.mrb[27].mxu1 }
 0x1b1   : > { %3725 = vmatmul.mubr.msk.f32.gmra.mrb[4].mxu0 %vm578_vm15, %v3712_v6 }
 0x1b2   : > { %3727 = vmatprep.mubr.msk.f32.mxu0 %vm578_vm15, %v1012_v10  ;;  %v3746_v17 = vpop.f32.mrb[28].mxu1 }
 0x1b3   : > { %v1321_v18 = vpop.f32.mrb[29].mxu1 }
 0x1b5   : > { %3728 = vmatmul.mubr.msk.f32.gmra.mrb[6].mxu0 %vm578_vm15, %v3715_v9 }
 0x1b6   : > { %3752 = vmatprep.mubr.msk.f32.mxu0 %vm578_vm15, %v1301_v14  ;;  %v3749_v19 = vpop.f32.mrb[30].mxu1 }
 0x1b7   : > { %v1331_v20 = vpop.f32.mrb[31].mxu1 }
 0x1b9   : > { %3753 = vmatmul.mubr.msk.f32.vlgmr.msra.gmra.mrb[0].mxu0 %vm578_vm15, %v3740_v13 }
 0x1ba   : > { %3755 = vmatprep.mubr.msk.f32.mxu0 %vm578_vm15, %v1311_v16  ;;  %3785 = vmatpush3.msk.msra.mxu0 %vm603_vm4, %v3318_v11 }
 0x1bb   : > { %v3774_v22 = vpop.f32.mrb[32].mxu1  ;;  %3818 = vmatprep.subr.msk.mxu0 %vm603_vm4, %v3344_v21 }
 0x1bc   : > { %v1620_v23 = vpop.f32.mrb[33].mxu1 }
 0x1bd   : > { %3756 = vmatmul.mubr.msk.f32.gmra.mrb[2].mxu0 %vm578_vm15, %v3743_v15 }
 0x1be   : > { %3758 = vmatprep.mubr.msk.f32.mxu0 %vm578_vm15, %v1321_v18 }
 0x1c1   : > { %3759 = vmatmul.mubr.msk.f32.gmra.mrb[4].mxu0 %vm578_vm15, %v3746_v17 }
 0x1c2   : > { %3761 = vmatprep.mubr.msk.f32.mxu0 %vm578_vm15, %v1331_v20  ;;  %v3777_v25 = vpop.f32.mrb[34].mxu1 }
 0x1c3   : > { %v1630_v26 = vpop.f32.mrb[35].mxu1 }
 0x1c5   : > { %3762 = vmatmul.mubr.msk.f32.gmra.mrb[6].mxu0 %vm578_vm15, %v3749_v19 }
 0x1c6   : > { %v3780_v28 = vpop.f32.mrb[36].mxu1  ;;  %3786 = vmatprep.mubr.msk.f32.mxu0 %vm578_vm15, %v1620_v23 }
 0x1c7   : > { %v1640_v29 = vpop.f32.mrb[37].mxu1 }
 0x1c9   : > { %3787 = vmatmul.mubr.msk.f32.vlgmr.msra.gmra.mrb[0].mxu0 %vm578_vm15, %v3774_v22 }
 0x1ca   : > { %v3783_v8 = vpop.f32.mrb[38].mxu1  ;;  %3789 = vmatprep.mubr.msk.f32.mxu0 %vm578_vm15, %v1630_v26  ;;  %3819 = vmatpush3.msk.msra.mxu0 %vm603_vm4, %v3344_v21 }
 0x1cb   : > { %v1650_v31 = vpop.f32.mrb[39].mxu1  ;;  %3852 = vmatprep.subr.msk.mxu0 %vm603_vm4, %v3370_v30 }
 0x1cd   : > { %3790 = vmatmul.mubr.msk.f32.gmra.mrb[2].mxu0 %vm578_vm15, %v3777_v25 }
 0x1ce   : > { %3792 = vmatprep.mubr.msk.f32.mxu0 %vm578_vm15, %v1640_v29 }
 0x1cf   : > { %v3808_v32 = vpop.f32.mrb[40].mxu1 }
 0x1d0   : > { %v1939_v33 = vpop.f32.mrb[41].mxu1 }
 0x1d1   : > { %3793 = vmatmul.mubr.msk.f32.gmra.mrb[4].mxu0 %vm578_vm15, %v3780_v28 }
 0x1d2   : > { %3795 = vmatprep.mubr.msk.f32.mxu0 %vm578_vm15, %v1650_v31 }
 0x1d4   : > { %v3811_v34 = vpop.f32.mrb[42].mxu1 }
 0x1d5   : > { %3796 = vmatmul.mubr.msk.f32.gmra.mrb[6].mxu0 %vm578_vm15, %v3783_v8  ;;  %v1949_v35 = vpop.f32.mrb[43].mxu1 }
 0x1d6   : > { %3820 = vmatprep.mubr.msk.f32.mxu0 %vm578_vm15, %v1939_v33 }
 0x1d8   : > { %v3814_v12 = vpop.f32.mrb[44].mxu1 }
 0x1d9   : > { %v1959_v37 = vpop.f32.mrb[45].mxu1  ;;  %3821 = vmatmul.mubr.msk.f32.vlgmr.msra.gmra.mrb[0].mxu0 %vm578_vm15, %v3808_v32 }
 0x1da   : > { %3823 = vmatprep.mubr.msk.f32.mxu0 %vm578_vm15, %v1949_v35  ;;  %3853 = vmatpush3.msk.msra.mxu0 %vm603_vm4, %v3370_v30 }
 0x1db   : > { %3886 = vmatprep.subr.msk.mxu0 %vm603_vm4, %v3396_v36 }
 0x1dc   : > { %v3817_v38 = vpop.f32.mrb[46].mxu1 }
 0x1dd   : > { %v1969_v39 = vpop.f32.mrb[47].mxu1  ;;  %3824 = vmatmul.mubr.msk.f32.gmra.mrb[2].mxu0 %vm578_vm15, %v3811_v34 }
 0x1de   : > { %3826 = vmatprep.mubr.msk.f32.mxu0 %vm578_vm15, %v1959_v37 }
 0x1e1   : > { %3827 = vmatmul.mubr.msk.f32.gmra.mrb[4].mxu0 %vm578_vm15, %v3814_v12  ;;  %v3842_v40 = vpop.f32.mrb[48].mxu1 }
 0x1e2   : > { %3829 = vmatprep.mubr.msk.f32.mxu0 %vm578_vm15, %v1969_v39  ;;  %v2258_v41 = vpop.f32.mrb[49].mxu1 }
 0x1e5   : > { %3830 = vmatmul.mubr.msk.f32.gmra.mrb[6].mxu0 %vm578_vm15, %v3817_v38 }
 0x1e6   : > { %3854 = vmatprep.mubr.msk.f32.mxu0 %vm578_vm15, %v2258_v41 }
 0x1e8   : > { %v3845_v42 = vpop.f32.mrb[50].mxu1 }
 0x1e9   : > { %v2268_v44 = vpop.f32.mrb[51].mxu1  ;;  %3855 = vmatmul.mubr.msk.f32.vlgmr.msra.gmra.mrb[0].mxu0 %vm578_vm15, %v3842_v40 }
 0x1ea   : > { %3857 = vmatprep.mubr.msk.f32.mxu0 %vm578_vm15, %v2268_v44  ;;  %3887 = vmatpush3.msk.msra.mxu0 %vm603_vm4, %v3396_v36 }
 0x1eb   : > { %3920 = vmatprep.subr.msk.mxu0 %vm603_vm4, %v3422_v43 }
 0x1ec   : > { %v3848_v45 = vpop.f32.mrb[52].mxu1 }
 0x1ed   : > { %v2278_v46 = vpop.f32.mrb[53].mxu1  ;;  %3858 = vmatmul.mubr.msk.f32.gmra.mrb[2].mxu0 %vm578_vm15, %v3845_v42 }
 0x1ee   : > { %3860 = vmatprep.mubr.msk.f32.mxu0 %vm578_vm15, %v2278_v46 }
 0x1f0   : > { %v3851_v47 = vpop.f32.mrb[54].mxu1 }
 0x1f1   : > { %v2288_v48 = vpop.f32.mrb[55].mxu1  ;;  %3861 = vmatmul.mubr.msk.f32.gmra.mrb[4].mxu0 %vm578_vm15, %v3848_v45 }
 0x1f2   : > { %3863 = vmatprep.mubr.msk.f32.mxu0 %vm578_vm15, %v2288_v48 }
 0x1f5   : > { %3864 = vmatmul.mubr.msk.f32.gmra.mrb[6].mxu0 %vm578_vm15, %v3851_v47  ;;  %v3876_v49 = vpop.f32.mrb[56].mxu1 }
 0x1f6   : > { %v2577_v50 = vpop.f32.mrb[57].mxu1 }
 0x1f7   : > { %3888 = vmatprep.mubr.msk.f32.mxu0 %vm578_vm15, %v2577_v50 }
 0x1f9   : > { %3889 = vmatmul.mubr.msk.f32.vlgmr.msra.gmra.mrb[0].mxu0 %vm578_vm15, %v3876_v49 }
 0x1fa   : > { %v3879_v51 = vpop.f32.mrb[58].mxu1  ;;  %3921 = vmatpush3.msk.msra.mxu0 %vm603_vm4, %v3422_v43 }
 0x1fb   : > { %v2587_v52 = vpop.f32.mrb[59].mxu1 }
 0x1fc   : > { %3891 = vmatprep.mubr.msk.f32.mxu0 %vm578_vm15, %v2587_v52 }
 0x1fd   : > { %3892 = vmatmul.mubr.msk.f32.gmra.mrb[2].mxu0 %vm578_vm15, %v3879_v51 }
 0x1fe   : > { %v3882_v53 = vpop.f32.mrb[60].mxu1 }
 0x1ff   : > { %v2597_v54 = vpop.f32.mrb[61].mxu1 }
 0x200   : > { %3894 = vmatprep.mubr.msk.f32.mxu0 %vm578_vm15, %v2597_v54 }
 0x201   : > { %3895 = vmatmul.mubr.msk.f32.gmra.mrb[4].mxu0 %vm578_vm15, %v3882_v53 }
 0x202   : > { %v3885_v55 = vpop.f32.mrb[62].mxu1 }
 0x203   : > { %v2607_v56 = vpop.f32.mrb[63].mxu1 }
 0x204   : > { %3897 = vmatprep.mubr.msk.f32.mxu0 %vm578_vm15, %v2607_v56 }
 0x205   : > { %3898 = vmatmul.mubr.msk.f32.gmra.mrb[6].mxu0 %vm578_vm15, %v3885_v55 }
 0x207   : > { %v3910_v57 = vpop.f32.mrb[64].mxu1 }
 0x208   : > { %v2896_v58 = vpop.f32.mrb[65].mxu1 }
 0x209   : > { %3922 = vmatprep.mubr.msk.f32.mxu0 %vm578_vm15, %v2896_v58 }
 0x20a   : > { %3923 = vmatmul.mubr.msk.f32.vlgmr.msra.gmra.mrb[0].mxu0 %vm578_vm15, %v3910_v57 }
 0x20e   : > { %v3913_v59 = vpop.f32.mrb[66].mxu1 }
 0x20f   : > { %v2906_v24 = vpop.f32.mrb[67].mxu1 }
 0x210   : > { %3925 = vmatprep.mubr.msk.f32.mxu0 %vm578_vm15, %v2906_v24 }
 0x211   : > { %3926 = vmatmul.mubr.msk.f32.gmra.mrb[2].mxu0 %vm578_vm15, %v3913_v59 }
 0x212   : > { %v3916_v27 = vpop.f32.mrb[68].mxu1 }
 0x213   : > { %v2916_v60 = vpop.f32.mrb[69].mxu1 }
 0x214   : > { %3928 = vmatprep.mubr.msk.f32.mxu0 %vm578_vm15, %v2916_v60 }
 0x215   : > { %3929 = vmatmul.mubr.msk.f32.gmra.mrb[4].mxu0 %vm578_vm15, %v3916_v27 }
 0x216   : > { %v3919_v61 = vpop.f32.mrb[70].mxu1 }
 0x217   : > { %v2926_v62 = vpop.f32.mrb[71].mxu1 }
 0x218   : > { %3931 = vmatprep.mubr.msk.f32.mxu0 %vm578_vm15, %v2926_v62 }
 0x219   : > { %3932 = vmatmul.mubr.msk.f32.gmra.mrb[6].mxu0 %vm578_vm15, %v3919_v61 }
 0x2dd   : > { %v3924_v63 = vpop.f32.mrb[0].mxu0 }
 0x2de   : > { %3078 = vst [vmem:[%s193_s7 + $0x8] sm:$0xff] %v3924_v63  ;;  %v3030_v0 = vpop.f32.mrb[1].mxu0 }
 0x2df   : > { %3077 = vst [vmem:[%s193_s7] sm:$0xff] %v3030_v0 }
 0x2e4   : > { %v3927_v1 = vpop.f32.mrb[2].mxu0 }
 0x2e5   : > { %3080 = vst [vmem:[%s193_s7 + $0x18] sm:$0xff] %v3927_v1  ;;  %v3040_v2 = vpop.f32.mrb[3].mxu0 }
 0x2e6   : > { %3079 = vst [vmem:[%s193_s7 + $0x10] sm:$0xff] %v3040_v2 }
 0x2e8   : > { %v3930_v3 = vpop.f32.mrb[4].mxu0 }
 0x2e9   : > { %3082 = vst [vmem:[%s193_s7 + $0x28] sm:$0xff] %v3930_v3  ;;  %v3050_v4 = vpop.f32.mrb[5].mxu0 }
 0x2ea   : > { %3081 = vst [vmem:[%s193_s7 + $0x20] sm:$0xff] %v3050_v4 }
 0x2ec   : > { %v3933_v5 = vpop.f32.mrb[6].mxu0 }
 0x2ed   : > { %3084 = vst [vmem:[%s193_s7 + $0x38] sm:$0xff] %v3933_v5  ;;  %v3060_v6 = vpop.f32.mrb[7].mxu0 }
 0x2ee   : > { %3083 = vst [vmem:[%s193_s7 + $0x30] sm:$0xff] %v3060_v6 }
 0x2ef   : > { %4184 = shalt.err (!%p4181_p7)
}
 0x2f0   : > { %s4185_s29 = scalar_lea.hbm %s4857_s21, 1024  ;;  %s4189_s7 = scalar_lea.hbm %s4916_s3, 8192 }
 0x2f1   : > { %p4186_p9 = scmp.ne.s32.totalorder %s4857_s21, %s4185_s29  ;;  %p4190_p12 = scmp.lt.u32.totalorder %s4857_s21, %s4916_s3 }
 0x2f2   : > { %p4191_p13 = scmp.lt.u32.totalorder %s4189_s7, %s4185_s29  ;;  %p4193_p1 = scmp.lt.u32.totalorder %s4185_s29, %s4857_s21 }
 0x2f3   : > { %p4187_p10 = pnand %p4186_p9, %p4351_p3 }
 0x2f4   : > { %p4192_p0 = por %p4191_p13, %p4190_p12 }
 0x2f5   : > { %p4188_p11 = pneg %p4187_p10 }
 0x2f6   : > { %p4194_p2 = por %p4193_p1, %p4192_p0 }
 0x2f8   : > { %p4195_p4 = pnand %p4194_p2, %p4188_p11 }
 0x2fa   : > { %4198 = shalt.err (!%p4195_p4)
}
 0x2fb   : > { %s4278_s10 = smov 128   ;;  %s4279_s15 = smov 8  }
 0x2fc   : > { %4070 = dma.vmem_to_hbm [thread:$0]  (%p4351_p3), %s4859_s11, 1024, %s4857_s21, %s4861_s16, %s4278_s10, %s4278_s10, %s4279_s15  }
 0x2fd PF: > { %p4076_p5 = scmp.ge.s32.totalorder %s4265_s19, 2  ;;  %s3116_s20 = sand.u32 1, %s4237_s12  }
 0x2fe   : > { %s3117_s4 = scalar_lea.sflag [#allocation3], %s3116_s20 }
 0x2ff   : > { %p4073_p6 = pnand %p4076_p5, %p4360_p8 }
 0x301   : > { %4232 = dma.done.wait (!%p4073_p6), %s3117_s4, 1024  }
 0x302   : > { %4234 = vsyncadd (!%p4073_p6), %s3117_s4, 4294966272  ;;  %s16_s19 = sadd.s32 1, %s4265_s19   ;;  %s4919_s12 = smov %s4241_s13 }
 0x303   : > { %p13_p7 = scmp.ge.s32.totalorder %s16_s19, 10   ;;  %s4920_s13 = smov %s4245_s14 }
 0x304   : > { %s4921_s14 = smov %s4369_s30  ;;  %s4922_s15 = smov %s4257_s17 }
 0x305   : > { %s4923_s16 = smov %s4261_s18  ;;  %s4924_s17 = smov %s4927_s22 }
 0x306   : > { %s4925_s18 = smov %s4931_s23  ;;  %15 = sbr.rel (!%p13_p7) target bundleno = 5 (0x5), region = 78 }
 0x30d   :  { %3122 = vsyncpa [#allocation3], 1 }
 0x30e   :  { %3124 = vsyncpa [#allocation3 + $0x1], 1 }

</bundles_post_ra>
